<compile_context>
chip_gen: v7x
topology: tpu7x:2x2x1
jax: 0.10.0
libtpu: 0.0.40
codegen_flags: <defaults>
</compile_context>

<pallas_src>
import functools
from itertools import product

import jax
import jax.numpy as jnp
from jax import lax
from jax.experimental import pallas as pl
from jax.experimental.pallas import tpu as pltpu

BN_EPS = 1e-5
LRELU_SLOPE = 0.2
LANE = 128           # lane width: Cin / Cout padded to multiples of this
SUBLANE = 16         # bf16 sublane packing granularity for row counts
TMB_TARGET = 2048    # Pass-B rows per tile (elementwise pass is HBM-bound)
VMEM_LIMIT = 32 * 1024 * 1024


def _round_up(x, m):
    return (x + m - 1) // m * m


# ---------------- Pass A: fused im2col conv + per-image BN partial stats ----

def _make_conv_stats_kernel(taps, mr_p, inv_cnt):
    """taps: tuple of (tap_index k, static row offset into the input slab)."""

    def kernel(z_ref, w_ref, mask_ref, y_ref, stats_ref):
        # 9 shift-accumulated matmuls: bf16 operands, f32 accumulation.
        acc = None
        for k, off in taps:
            xs = z_ref[off:off + mr_p, :].astype(jnp.bfloat16)
            d = jnp.dot(xs, w_ref[k], preferred_element_type=jnp.float32)
            acc = d if acc is None else acc + d

        mask = mask_ref[...]                             # (mr_p, 1) f32 0/1
        accm = acc * mask
        ch_sum = jnp.sum(accm, axis=0, keepdims=True)    # (1, Cout_p)
        mu = ch_sum * inv_cnt                            # per-image mean
        cent = (acc - mu) * mask                         # centered, masked
        stats_ref[0:1, :] = ch_sum
        stats_ref[1:2, :] = jnp.sum(cent * cent, axis=0, keepdims=True)

        y_ref[...] = acc.astype(y_ref.dtype)             # bf16 writeback

    return kernel


# ---------------- Pass B: folded BN affine + LeakyReLU (f32 math) -----------

def _scale_shift_lrelu_kernel(y_ref, scale_ref, shift_ref, o_ref):
    z = y_ref[...].astype(jnp.float32) * scale_ref[...] + shift_ref[...]
    o_ref[...] = jnp.where(z > 0, z, LRELU_SLOPE * z)


@functools.partial(jax.jit, static_argnames=("stride",))
def conv_block_forward(x_nchw, weight_oihw, bias, gamma, beta, *, stride):
    """Equivalent of ConvBlock.forward on NCHW float32 input."""
    del bias  # exactly cancelled by the BatchNorm batch-mean subtraction
    nb, cin, h, w = x_nchw.shape
    cout = weight_oihw.shape[0]
    s = stride
    ho = (h + 2 - 3) // s + 1
    wo = (w + 2 - 3) // s + 1

    cin_p = _round_up(cin, LANE)
    cout_p = _round_up(cout, LANE)

    # ---- phase-decomposed, spatially flattened input slab (one HBM pass) ---
    x_nhwc = jnp.transpose(x_nchw, (0, 2, 3, 1)).astype(jnp.float32)
    hp = _round_up(h + 2, s)
    wp = _round_up(w + 2, s)
    xp = jnp.pad(x_nhwc, ((0, 0), (1, hp - h - 1), (1, wp - w - 1),
                          (0, cin_p - cin)))
    hq, wq = hp // s, wp // s

    mr = ho * wq                            # accumulator rows / image (Wq-wide)
    mr_p = _round_up(mr, SUBLANE)           # bf16 y block granularity
    off_max = (2 // s) * (wq + 1)           # largest tap offset into a phase
    rows_p = _round_up(max(hq * wq, off_max + mr_p), SUBLANE)

    phases = []
    for ph in range(s):
        for pw in range(s):
            zp = xp[:, ph::s, pw::s, :].reshape(nb, hq * wq, cin_p)
            zp = jnp.pad(zp, ((0, 0), (0, rows_p - hq * wq), (0, 0)))
            phases.append(zp)
    z_all = jnp.stack(phases, axis=1).reshape(nb, s * s * rows_p, cin_p)

    # Torch weight [Cout, Cin, 3, 3] -> 9 taps of [Cin, Cout] (k = dh*3 + dw).
    w_taps = jnp.transpose(weight_oihw, (2, 3, 1, 0)).reshape(9, cin, cout)
    w_taps = jnp.pad(w_taps, ((0, 0), (0, cin_p - cin), (0, cout_p - cout)))
    w_taps = w_taps.astype(jnp.bfloat16)

    # Validity mask over the Wq-wide accumulator rows (garbage cols excluded).
    r = jnp.arange(mr_p)
    mask = (((r % wq) < wo) & (r < mr)).astype(jnp.float32).reshape(mr_p, 1)

    # Static per-tap row offsets into the flattened phase slab.
    taps = []
    for k, (dh, dw) in enumerate(product(range(3), range(3))):
        phase = (dh % s) * s + (dw % s)
        off = phase * rows_p + (dh // s) * wq + (dw // s)
        taps.append((k, off))
    taps = tuple(taps)

    kernel_a = _make_conv_stats_kernel(taps, mr_p, 1.0 / float(ho * wo))

    # ---- Pass A: fused conv + per-image partial stats (fully parallel) -----
    y_flat, partial_stats = pl.pallas_call(
        kernel_a,
        out_shape=(jax.ShapeDtypeStruct((nb * mr_p, cout_p), jnp.bfloat16),
                   jax.ShapeDtypeStruct((nb, 2, cout_p), jnp.float32)),
        grid=(nb,),
        in_specs=[
            pl.BlockSpec((None, s * s * rows_p, cin_p), lambda i: (i, 0, 0)),
            pl.BlockSpec((9, cin_p, cout_p), lambda i: (0, 0, 0)),
            pl.BlockSpec((mr_p, 1), lambda i: (0, 0)),
        ],
        out_specs=(
            pl.BlockSpec((mr_p, cout_p), lambda i: (i, 0)),
            pl.BlockSpec((None, 2, cout_p), lambda i: (i, 0, 0)),
        ),
        compiler_params=pltpu.CompilerParams(
            dimension_semantics=("parallel",),
            vmem_limit_bytes=VMEM_LIMIT),
    )(z_all, w_taps, mask)

    # ---- fold BN into per-channel scale/shift (tiny, plain JAX) ------------
    sums = partial_stats[:, 0, :]                       # (N, Cout_p)
    m2s = partial_stats[:, 1, :]                        # (N, Cout_p)
    cnt = float(ho * wo)
    tot = float(nb) * cnt
    mean = jnp.sum(sums, axis=0) / tot
    mu_i = sums / cnt
    var = (jnp.sum(m2s, axis=0)
           + cnt * jnp.sum((mu_i - mean) ** 2, axis=0)) / tot
    var = jnp.maximum(var, 0.0)                         # biased batch variance
    inv_std = lax.rsqrt(var + BN_EPS)
    gamma_p = jnp.pad(gamma.astype(jnp.float32), (0, cout_p - cout))
    beta_p = jnp.pad(beta.astype(jnp.float32), (0, cout_p - cout))
    scale = (gamma_p * inv_std).reshape(1, cout_p)
    shift = (beta_p - mean * gamma_p * inv_std).reshape(1, cout_p)

    # ---- Pass B: y*scale + shift, LeakyReLU (large tiles, bf16 reads) ------
    total = nb * mr_p
    tmb = min(TMB_TARGET, total)                        # total is a mult of 16
    total_p = _round_up(total, tmb)
    y_in = y_flat if total_p == total else jnp.pad(
        y_flat, ((0, total_p - total), (0, 0)))

    out_flat = pl.pallas_call(
        _scale_shift_lrelu_kernel,
        out_shape=jax.ShapeDtypeStruct((total_p, cout_p), jnp.float32),
        grid=(total_p // tmb,),
        in_specs=[
            pl.BlockSpec((tmb, cout_p), lambda i: (i, 0)),
            pl.BlockSpec((1, cout_p), lambda i: (0, 0)),
            pl.BlockSpec((1, cout_p), lambda i: (0, 0)),
        ],
        out_specs=pl.BlockSpec((tmb, cout_p), lambda i: (i, 0)),
        compiler_params=pltpu.CompilerParams(
            dimension_semantics=("parallel",),
            vmem_limit_bytes=VMEM_LIMIT),
    )(y_in, scale, shift)

    # ---- strip padding / garbage columns, back to NCHW ---------------------
    out = out_flat[:total].reshape(nb, mr_p, cout_p)[:, :mr, :cout]
    out = out.reshape(nb, ho, wq, cout)[:, :, :wo, :]
    return jnp.transpose(out, (0, 3, 1, 2))


def _reference(x_nchw, weight_oihw, bias, gamma, beta, stride):
    """Pure-JAX f32 reference (bias included; it cancels through BN)."""
    x_nhwc = jnp.transpose(x_nchw, (0, 2, 3, 1))
    w_hwio = jnp.transpose(weight_oihw, (2, 3, 1, 0))
    y = lax.conv_general_dilated(
        x_nhwc, w_hwio, window_strides=(stride, stride),
        padding=((1, 1), (1, 1)),
        dimension_numbers=("NHWC", "HWIO", "NHWC"))
    y = y + bias
    mean = jnp.mean(y, axis=(0, 1, 2))
    var = jnp.mean((y - mean) ** 2, axis=(0, 1, 2))
    y_hat = (y - mean) * lax.rsqrt(var + BN_EPS)
    z = y_hat * gamma + beta
    z = jnp.where(z > 0, z, LRELU_SLOPE * z)
    return jnp.transpose(z, (0, 3, 1, 2))


if __name__ == "__main__":
    # Small deterministic config: batch=2, in=4, out=8, spatial=16, stride=2.
    N, CIN, COUT, H, W, STRIDE = 2, 4, 8, 16, 16, 2

    key = jax.random.PRNGKey(0)
    kx, kw, kb = jax.random.split(key, 3)
    x = jax.random.normal(kx, (N, CIN, H, W), dtype=jnp.float32)
    weight = jax.random.normal(kw, (COUT, CIN, 3, 3), dtype=jnp.float32) * 0.1
    bias = jax.random.normal(kb, (COUT,), dtype=jnp.float32) * 0.1
    gamma = jnp.ones((COUT,), dtype=jnp.float32)   # BatchNorm2d weight init
    beta = jnp.zeros((COUT,), dtype=jnp.float32)   # BatchNorm2d bias init

    out = conv_block_forward(x, weight, bias, gamma, beta, stride=STRIDE)
    out = jax.block_until_ready(out)

    ref = _reference(x, weight, bias, gamma, beta, STRIDE)
    assert out.shape == (N, COUT, H // STRIDE, W // STRIDE), out.shape
    # bf16 MXU operands (f32 accumulation) vs f32 reference on BN-normalized
    # (unit-scale) outputs -> ~1e-3 typical error; 2e-2 is a safe bound.
    assert jnp.allclose(out, ref, atol=2e-2, rtol=2e-2), float(
        jnp.max(jnp.abs(out - ref)))

    print("KERNEL_OK")
</pallas_src>

<mosaic_0001>
module attributes {stable_mosaic.version = 11 : i64} {
  func.func @_scale_shift_lrelu_kernel(%arg0: i32, %arg1: memref<160x128xbf16, #tpu.memory_space<vmem>>, %arg2: memref<1x128xf32, #tpu.memory_space<vmem>>, %arg3: memref<1x128xf32, #tpu.memory_space<vmem>>, %arg4: memref<160x128xf32, #tpu.memory_space<vmem>>) attributes {dimension_semantics = [#tpu.dimension_semantics<parallel>], iteration_bounds = array<i64: 1>, scalar_prefetch = 0 : i64, scratch_operands = 0 : i64, tpu.core_type = #tpu.core_type<tc>, window_params = [{transform_indices = @transform_0, window_bounds = array<i64: 160, 128>}, {pipeline_mode = #tpu.pipeline_mode<synchronous>, transform_indices = @transform_1, window_bounds = array<i64: 1, 128>}, {pipeline_mode = #tpu.pipeline_mode<synchronous>, transform_indices = @transform_2, window_bounds = array<i64: 1, 128>}, {transform_indices = @transform_3, window_bounds = array<i64: 160, 128>}]} {
    %c0 = arith.constant 0 : index
    %c0_0 = arith.constant 0 : index
    %0 = vector.load %arg1[%c0, %c0_0] : memref<160x128xbf16, #tpu.memory_space<vmem>>, vector<160x128xbf16>
    %1 = arith.extf %0 : vector<160x128xbf16> to vector<160x128xf32>
    %c0_1 = arith.constant 0 : index
    %c0_2 = arith.constant 0 : index
    %2 = vector.load %arg2[%c0_1, %c0_2] : memref<1x128xf32, #tpu.memory_space<vmem>>, vector<1x128xf32>
    %3 = vector.broadcast %2 : vector<1x128xf32> to vector<160x128xf32>
    %4 = arith.mulf %1, %3 : vector<160x128xf32>
    %c0_3 = arith.constant 0 : index
    %c0_4 = arith.constant 0 : index
    %5 = vector.load %arg3[%c0_3, %c0_4] : memref<1x128xf32, #tpu.memory_space<vmem>>, vector<1x128xf32>
    %6 = vector.broadcast %5 : vector<1x128xf32> to vector<160x128xf32>
    %7 = arith.addf %4, %6 : vector<160x128xf32>
    %cst = arith.constant 0.000000e+00 : f32
    %8 = vector.broadcast %cst : f32 to vector<160x128xf32>
    %9 = arith.cmpf ogt, %7, %8 : vector<160x128xf32>
    %cst_5 = arith.constant 2.000000e-01 : f32
    %10 = vector.broadcast %cst_5 : f32 to vector<160x128xf32>
    %11 = arith.mulf %10, %7 : vector<160x128xf32>
    %12 = arith.select %9, %7, %11 : vector<160x128xi1>, vector<160x128xf32>
    %c0_6 = arith.constant 0 : index
    %c0_7 = arith.constant 0 : index
    %13 = vector.load %arg4[%c0_6, %c0_7] : memref<160x128xf32, #tpu.memory_space<vmem>>, vector<160x128xf32>
    tpu.vector_store %arg4[%c0_6, %c0_7], %12 {strides = array<i32>} : memref<160x128xf32, #tpu.memory_space<vmem>>, vector<160x128xf32>,
    return
  }
  func.func @transform_0(%arg0: i32) -> (i32, i32) {
    %c0_i32 = arith.constant 0 : i32
    %c0_i32_0 = arith.constant 0 : i32
    return %arg0, %c0_i32 : i32, i32
  }
  func.func @transform_1(%arg0: i32) -> (i32, i32) {
    %c0_i32 = arith.constant 0 : i32
    %c0_i32_0 = arith.constant 0 : i32
    %c0_i32_1 = arith.constant 0 : i32
    return %c0_i32, %c0_i32_0 : i32, i32
  }
  func.func @transform_2(%arg0: i32) -> (i32, i32) {
    %c0_i32 = arith.constant 0 : i32
    %c0_i32_0 = arith.constant 0 : i32
    %c0_i32_1 = arith.constant 0 : i32
    return %c0_i32, %c0_i32_0 : i32, i32
  }
  func.func @transform_3(%arg0: i32) -> (i32, i32) {
    %c0_i32 = arith.constant 0 : i32
    %c0_i32_0 = arith.constant 0 : i32
    return %arg0, %c0_i32 : i32, i32
  }
}

module attributes {stable_mosaic.version = 11 : i64} {
  func.func @kernel(%arg0: i32, %arg1: memref<1x384x128xf32, #tpu.memory_space<vmem>>, %arg2: memref<9x128x128xbf16, #tpu.memory_space<vmem>>, %arg3: memref<80x1xf32, #tpu.memory_space<vmem>>, %arg4: memref<80x128xbf16, #tpu.memory_space<vmem>>, %arg5: memref<1x2x128xf32, #tpu.memory_space<vmem>>) attributes {dimension_semantics = [#tpu.dimension_semantics<parallel>], iteration_bounds = array<i64: 2>, scalar_prefetch = 0 : i64, scratch_operands = 0 : i64, tpu.core_type = #tpu.core_type<tc>, window_params = [{transform_indices = @transform_0, window_bounds = array<i64: 1, 384, 128>}, {pipeline_mode = #tpu.pipeline_mode<synchronous>, transform_indices = @transform_1, window_bounds = array<i64: 9, 128, 128>}, {pipeline_mode = #tpu.pipeline_mode<synchronous>, transform_indices = @transform_2, window_bounds = array<i64: 80, 1>}, {transform_indices = @transform_3, window_bounds = array<i64: 80, 128>}, {transform_indices = @transform_4, window_bounds = array<i64: 1, 2, 128>}]} {
    %c0 = arith.constant 0 : index
    %c0_0 = arith.constant 0 : index
    %c0_1 = arith.constant 0 : index
    %0 = vector.load %arg1[%c0, %c0_0, %c0_1] : memref<1x384x128xf32, #tpu.memory_space<vmem>>, vector<1x80x128xf32>
    %1 = vector.shape_cast %0 : vector<1x80x128xf32> to vector<80x128xf32>
    %2 = arith.truncf %1 : vector<80x128xf32> to vector<80x128xbf16>
    %c0_2 = arith.constant 0 : index
    %c0_3 = arith.constant 0 : index
    %c0_4 = arith.constant 0 : index
    %3 = vector.load %arg2[%c0_2, %c0_3, %c0_4] : memref<9x128x128xbf16, #tpu.memory_space<vmem>>, vector<1x128x128xbf16>
    %4 = vector.shape_cast %3 : vector<1x128x128xbf16> to vector<128x128xbf16>
    %cst = arith.constant dense<0.000000e+00> : vector<80x128xf32>
    %5 = tpu.matmul %2, %4, %cst {dimension_numbers = #tpu.dot_dimension_numbers<[1], [0], [0], [1], [0, 0, 1, 1], [], []>} : vector<80x128xbf16>, vector<128x128xbf16>, vector<80x128xf32> -> vector<80x128xf32>
    %c0_5 = arith.constant 0 : index
    %c96 = arith.constant 96 : index
    %c0_6 = arith.constant 0 : index
    %6 = vector.load %arg1[%c0_5, %c96, %c0_6] : memref<1x384x128xf32, #tpu.memory_space<vmem>>, vector<1x80x128xf32>
    %7 = vector.shape_cast %6 : vector<1x80x128xf32> to vector<80x128xf32>
    %8 = arith.truncf %7 : vector<80x128xf32> to vector<80x128xbf16>
    %c1 = arith.constant 1 : index
    %c0_7 = arith.constant 0 : index
    %c0_8 = arith.constant 0 : index
    %9 = vector.load %arg2[%c1, %c0_7, %c0_8] : memref<9x128x128xbf16, #tpu.memory_space<vmem>>, vector<1x128x128xbf16>
    %10 = vector.shape_cast %9 : vector<1x128x128xbf16> to vector<128x128xbf16>
    %cst_9 = arith.constant dense<0.000000e+00> : vector<80x128xf32>
    %11 = tpu.matmul %8, %10, %cst_9 {dimension_numbers = #tpu.dot_dimension_numbers<[1], [0], [0], [1], [0, 0, 1, 1], [], []>} : vector<80x128xbf16>, vector<128x128xbf16>, vector<80x128xf32> -> vector<80x128xf32>
    %12 = arith.addf %5, %11 : vector<80x128xf32>
    %c0_10 = arith.constant 0 : index
    %c1_11 = arith.constant 1 : index
    %c0_12 = arith.constant 0 : index
    %13 = vector.load %arg1[%c0_10, %c1_11, %c0_12] : memref<1x384x128xf32, #tpu.memory_space<vmem>>, vector<1x80x128xf32>
    %14 = vector.shape_cast %13 : vector<1x80x128xf32> to vector<80x128xf32>
    %15 = arith.truncf %14 : vector<80x128xf32> to vector<80x128xbf16>
    %c2 = arith.constant 2 : index
    %c0_13 = arith.constant 0 : index
    %c0_14 = arith.constant 0 : index
    %16 = vector.load %arg2[%c2, %c0_13, %c0_14] : memref<9x128x128xbf16, #tpu.memory_space<vmem>>, vector<1x128x128xbf16>
    %17 = vector.shape_cast %16 : vector<1x128x128xbf16> to vector<128x128xbf16>
    %cst_15 = arith.constant dense<0.000000e+00> : vector<80x128xf32>
    %18 = tpu.matmul %15, %17, %cst_15 {dimension_numbers = #tpu.dot_dimension_numbers<[1], [0], [0], [1], [0, 0, 1, 1], [], []>} : vector<80x128xbf16>, vector<128x128xbf16>, vector<80x128xf32> -> vector<80x128xf32>
    %19 = arith.addf %12, %18 : vector<80x128xf32>
    %c0_16 = arith.constant 0 : index
    %c192 = arith.constant 192 : index
    %c0_17 = arith.constant 0 : index
    %20 = vector.load %arg1[%c0_16, %c192, %c0_17] : memref<1x384x128xf32, #tpu.memory_space<vmem>>, vector<1x80x128xf32>
    %21 = vector.shape_cast %20 : vector<1x80x128xf32> to vector<80x128xf32>
    %22 = arith.truncf %21 : vector<80x128xf32> to vector<80x128xbf16>
    %c3 = arith.constant 3 : index
    %c0_18 = arith.constant 0 : index
    %c0_19 = arith.constant 0 : index
    %23 = vector.load %arg2[%c3, %c0_18, %c0_19] : memref<9x128x128xbf16, #tpu.memory_space<vmem>>, vector<1x128x128xbf16>
    %24 = vector.shape_cast %23 : vector<1x128x128xbf16> to vector<128x128xbf16>
    %cst_20 = arith.constant dense<0.000000e+00> : vector<80x128xf32>
    %25 = tpu.matmul %22, %24, %cst_20 {dimension_numbers = #tpu.dot_dimension_numbers<[1], [0], [0], [1], [0, 0, 1, 1], [], []>} : vector<80x128xbf16>, vector<128x128xbf16>, vector<80x128xf32> -> vector<80x128xf32>
    %26 = arith.addf %19, %25 : vector<80x128xf32>
    %c0_21 = arith.constant 0 : index
    %c288 = arith.constant 288 : index
    %c0_22 = arith.constant 0 : index
    %27 = vector.load %arg1[%c0_21, %c288, %c0_22] : memref<1x384x128xf32, #tpu.memory_space<vmem>>, vector<1x80x128xf32>
    %28 = vector.shape_cast %27 : vector<1x80x128xf32> to vector<80x128xf32>
    %29 = arith.truncf %28 : vector<80x128xf32> to vector<80x128xbf16>
    %c4 = arith.constant 4 : index
    %c0_23 = arith.constant 0 : index
    %c0_24 = arith.constant 0 : index
    %30 = vector.load %arg2[%c4, %c0_23, %c0_24] : memref<9x128x128xbf16, #tpu.memory_space<vmem>>, vector<1x128x128xbf16>
    %31 = vector.shape_cast %30 : vector<1x128x128xbf16> to vector<128x128xbf16>
    %cst_25 = arith.constant dense<0.000000e+00> : vector<80x128xf32>
    %32 = tpu.matmul %29, %31, %cst_25 {dimension_numbers = #tpu.dot_dimension_numbers<[1], [0], [0], [1], [0, 0, 1, 1], [], []>} : vector<80x128xbf16>, vector<128x128xbf16>, vector<80x128xf32> -> vector<80x128xf32>
    %33 = arith.addf %26, %32 : vector<80x128xf32>
    %c0_26 = arith.constant 0 : index
    %c193 = arith.constant 193 : index
    %c0_27 = arith.constant 0 : index
    %34 = vector.load %arg1[%c0_26, %c193, %c0_27] : memref<1x384x128xf32, #tpu.memory_space<vmem>>, vector<1x80x128xf32>
    %35 = vector.shape_cast %34 : vector<1x80x128xf32> to vector<80x128xf32>
    %36 = arith.truncf %35 : vector<80x128xf32> to vector<80x128xbf16>
    %c5 = arith.constant 5 : index
    %c0_28 = arith.constant 0 : index
    %c0_29 = arith.constant 0 : index
    %37 = vector.load %arg2[%c5, %c0_28, %c0_29] : memref<9x128x128xbf16, #tpu.memory_space<vmem>>, vector<1x128x128xbf16>
    %38 = vector.shape_cast %37 : vector<1x128x128xbf16> to vector<128x128xbf16>
    %cst_30 = arith.constant dense<0.000000e+00> : vector<80x128xf32>
    %39 = tpu.matmul %36, %38, %cst_30 {dimension_numbers = #tpu.dot_dimension_numbers<[1], [0], [0], [1], [0, 0, 1, 1], [], []>} : vector<80x128xbf16>, vector<128x128xbf16>, vector<80x128xf32> -> vector<80x128xf32>
    %40 = arith.addf %33, %39 : vector<80x128xf32>
    %c0_31 = arith.constant 0 : index
    %c9 = arith.constant 9 : index
    %c0_32 = arith.constant 0 : index
    %41 = vector.load %arg1[%c0_31, %c9, %c0_32] : memref<1x384x128xf32, #tpu.memory_space<vmem>>, vector<1x80x128xf32>
    %42 = vector.shape_cast %41 : vector<1x80x128xf32> to vector<80x128xf32>
    %43 = arith.truncf %42 : vector<80x128xf32> to vector<80x128xbf16>
    %c6 = arith.constant 6 : index
    %c0_33 = arith.constant 0 : index
    %c0_34 = arith.constant 0 : index
    %44 = vector.load %arg2[%c6, %c0_33, %c0_34] : memref<9x128x128xbf16, #tpu.memory_space<vmem>>, vector<1x128x128xbf16>
    %45 = vector.shape_cast %44 : vector<1x128x128xbf16> to vector<128x128xbf16>
    %cst_35 = arith.constant dense<0.000000e+00> : vector<80x128xf32>
    %46 = tpu.matmul %43, %45, %cst_35 {dimension_numbers = #tpu.dot_dimension_numbers<[1], [0], [0], [1], [0, 0, 1, 1], [], []>} : vector<80x128xbf16>, vector<128x128xbf16>, vector<80x128xf32> -> vector<80x128xf32>
    %47 = arith.addf %40, %46 : vector<80x128xf32>
    %c0_36 = arith.constant 0 : index
    %c105 = arith.constant 105 : index
    %c0_37 = arith.constant 0 : index
    %48 = vector.load %arg1[%c0_36, %c105, %c0_37] : memref<1x384x128xf32, #tpu.memory_space<vmem>>, vector<1x80x128xf32>
    %49 = vector.shape_cast %48 : vector<1x80x128xf32> to vector<80x128xf32>
    %50 = arith.truncf %49 : vector<80x128xf32> to vector<80x128xbf16>
    %c7 = arith.constant 7 : index
    %c0_38 = arith.constant 0 : index
    %c0_39 = arith.constant 0 : index
    %51 = vector.load %arg2[%c7, %c0_38, %c0_39] : memref<9x128x128xbf16, #tpu.memory_space<vmem>>, vector<1x128x128xbf16>
    %52 = vector.shape_cast %51 : vector<1x128x128xbf16> to vector<128x128xbf16>
    %cst_40 = arith.constant dense<0.000000e+00> : vector<80x128xf32>
    %53 = tpu.matmul %50, %52, %cst_40 {dimension_numbers = #tpu.dot_dimension_numbers<[1], [0], [0], [1], [0, 0, 1, 1], [], []>} : vector<80x128xbf16>, vector<128x128xbf16>, vector<80x128xf32> -> vector<80x128xf32>
    %54 = arith.addf %47, %53 : vector<80x128xf32>
    %c0_41 = arith.constant 0 : index
    %c10 = arith.constant 10 : index
    %c0_42 = arith.constant 0 : index
    %55 = vector.load %arg1[%c0_41, %c10, %c0_42] : memref<1x384x128xf32, #tpu.memory_space<vmem>>, vector<1x80x128xf32>
    %56 = vector.shape_cast %55 : vector<1x80x128xf32> to vector<80x128xf32>
    %57 = arith.truncf %56 : vector<80x128xf32> to vector<80x128xbf16>
    %c8 = arith.constant 8 : index
    %c0_43 = arith.constant 0 : index
    %c0_44 = arith.constant 0 : index
    %58 = vector.load %arg2[%c8, %c0_43, %c0_44] : memref<9x128x128xbf16, #tpu.memory_space<vmem>>, vector<1x128x128xbf16>
    %59 = vector.shape_cast %58 : vector<1x128x128xbf16> to vector<128x128xbf16>
    %cst_45 = arith.constant dense<0.000000e+00> : vector<80x128xf32>
    %60 = tpu.matmul %57, %59, %cst_45 {dimension_numbers = #tpu.dot_dimension_numbers<[1], [0], [0], [1], [0, 0, 1, 1], [], []>} : vector<80x128xbf16>, vector<128x128xbf16>, vector<80x128xf32> -> vector<80x128xf32>
    %61 = arith.addf %54, %60 : vector<80x128xf32>
    %c0_46 = arith.constant 0 : index
    %c0_47 = arith.constant 0 : index
    %62 = vector.load %arg3[%c0_46, %c0_47] : memref<80x1xf32, #tpu.memory_space<vmem>>, vector<80x1xf32>
    %63 = vector.broadcast %62 : vector<80x1xf32> to vector<80x128xf32>
    %64 = arith.mulf %61, %63 : vector<80x128xf32>
    %cst_48 = arith.constant dense<0.000000e+00> : vector<128xf32>
    %65 = vector.multi_reduction <add>, %64, %cst_48 [0] : vector<80x128xf32> to vector<128xf32>
    %66 = vector.shape_cast %65 : vector<128xf32> to vector<1x128xf32>
    %cst_49 = arith.constant 1.562500e-02 : f32
    %67 = vector.broadcast %cst_49 : f32 to vector<1x128xf32>
    %68 = arith.mulf %66, %67 : vector<1x128xf32>
    %69 = vector.broadcast %68 : vector<1x128xf32> to vector<80x128xf32>
    %70 = arith.subf %61, %69 : vector<80x128xf32>
    %71 = vector.broadcast %62 : vector<80x1xf32> to vector<80x128xf32>
    %72 = arith.mulf %70, %71 : vector<80x128xf32>
    %c0_50 = arith.constant 0 : index
    %c0_51 = arith.constant 0 : index
    %c0_52 = arith.constant 0 : index
    %73 = vector.load %arg5[%c0_50, %c0_51, %c0_52] : memref<1x2x128xf32, #tpu.memory_space<vmem>>, vector<1x1x128xf32>
    %74 = vector.shape_cast %73 : vector<1x1x128xf32> to vector<1x128xf32>
    %75 = vector.shape_cast %66 : vector<1x128xf32> to vector<1x1x128xf32>
    tpu.vector_store %arg5[%c0_50, %c0_51, %c0_52], %75 {strides = array<i32>} : memref<1x2x128xf32, #tpu.memory_space<vmem>>, vector<1x1x128xf32>,
    %76 = arith.mulf %72, %72 : vector<80x128xf32>
    %cst_53 = arith.constant dense<0.000000e+00> : vector<128xf32>
    %77 = vector.multi_reduction <add>, %76, %cst_53 [0] : vector<80x128xf32> to vector<128xf32>
    %78 = vector.shape_cast %77 : vector<128xf32> to vector<1x128xf32>
    %c0_54 = arith.constant 0 : index
    %c1_55 = arith.constant 1 : index
    %c0_56 = arith.constant 0 : index
    %79 = vector.load %arg5[%c0_54, %c1_55, %c0_56] : memref<1x2x128xf32, #tpu.memory_space<vmem>>, vector<1x1x128xf32>
    %80 = vector.shape_cast %79 : vector<1x1x128xf32> to vector<1x128xf32>
    %81 = vector.shape_cast %78 : vector<1x128xf32> to vector<1x1x128xf32>
    tpu.vector_store %arg5[%c0_54, %c1_55, %c0_56], %81 {strides = array<i32>} : memref<1x2x128xf32, #tpu.memory_space<vmem>>, vector<1x1x128xf32>,
    %82 = arith.truncf %61 : vector<80x128xf32> to vector<80x128xbf16>
    %c0_57 = arith.constant 0 : index
    %c0_58 = arith.constant 0 : index
    %83 = vector.load %arg4[%c0_57, %c0_58] : memref<80x128xbf16, #tpu.memory_space<vmem>>, vector<80x128xbf16>
    tpu.vector_store %arg4[%c0_57, %c0_58], %82 {strides = array<i32>} : memref<80x128xbf16, #tpu.memory_space<vmem>>, vector<80x128xbf16>,
    return
  }
  func.func @transform_0(%arg0: i32) -> (i32, i32, i32) {
    %c0_i32 = arith.constant 0 : i32
    %c0_i32_0 = arith.constant 0 : i32
    %c0_i32_1 = arith.constant 0 : i32
    return %arg0, %c0_i32, %c0_i32_0 : i32, i32, i32
  }
  func.func @transform_1(%arg0: i32) -> (i32, i32, i32) {
    %c0_i32 = arith.constant 0 : i32
    %c0_i32_0 = arith.constant 0 : i32
    %c0_i32_1 = arith.constant 0 : i32
    %c0_i32_2 = arith.constant 0 : i32
    return %c0_i32, %c0_i32_0, %c0_i32_1 : i32, i32, i32
  }
  func.func @transform_2(%arg0: i32) -> (i32, i32) {
    %c0_i32 = arith.constant 0 : i32
    %c0_i32_0 = arith.constant 0 : i32
    %c0_i32_1 = arith.constant 0 : i32
    return %c0_i32, %c0_i32_0 : i32, i32
  }
  func.func @transform_3(%arg0: i32) -> (i32, i32) {
    %c0_i32 = arith.constant 0 : i32
    %c0_i32_0 = arith.constant 0 : i32
    return %arg0, %c0_i32 : i32, i32
  }
  func.func @transform_4(%arg0: i32) -> (i32, i32, i32) {
    %c0_i32 = arith.constant 0 : i32
    %c0_i32_0 = arith.constant 0 : i32
    %c0_i32_1 = arith.constant 0 : i32
    return %arg0, %c0_i32, %c0_i32_0 : i32, i32, i32
  }
}

</mosaic_0001>

<bundles_post_ra>
// kernel: conv_block_forward.3
= control target key start
LH: loop header
LB: loop body
LE: loop exit
PB: predicated region body
PF: predicated region fallthrough
CT: control target
= control target key end

     0   :  { %s403_s0 = inlined_call_operand.vmem [shape: bf16[160,128], index: 0, kind: input, shape index: {}]   ;;  %s404_s1 = inlined_call_operand.vmem [shape: f32[1,128], index: 1, kind: input, shape index: {}]   ;;  %s405_s2 = inlined_call_operand.vmem [shape: f32[1,128], index: 2, kind: input, shape index: {}]   ;;  %s406_s3 = inlined_call_operand.vmem [shape: f32[160,128], index: 3, kind: output, shape index: {}]  }
   0x1   :  { %v195_v0 = vld [vmem:[%s403_s0] sm:$0xff]   ;;  %v234_v4 = vld [vmem:[%s403_s0 + $0x8] sm:$0xff]   ;;  %v235_v5 = vld [vmem:[%s403_s0 + $0x10] sm:$0xff]  }
   0x2   :  { %v269_v1 = vld [vmem:[%s404_s1] ss:$0 sm:$0xff]  ;;  %v196_v2 = vunpack.c.l.bf16 %v195_v0  ;;  %v197_v3 = vunpack.c.h.bf16 %v195_v0  ;;  %v236_v6 = vld [vmem:[%s403_s0 + $0x18] sm:$0xff]   ;;  %v200_v8 = vunpack.c.l.bf16 %v234_v4  ;;  %v201_v9 = vunpack.c.h.bf16 %v234_v4  ;;  %v238_v36 = vld [vmem:[%s403_s0 + $0x28] sm:$0xff]  }
   0x3   :  { %v283_v7 = vld [vmem:[%s405_s2] ss:$0 sm:$0xff]  ;;  %v204_v10 = vunpack.c.l.bf16 %v235_v5  ;;  %v205_v11 = vunpack.c.h.bf16 %v235_v5  ;;  %v208_v14 = vunpack.c.l.bf16 %v236_v6  ;;  %v209_v15 = vunpack.c.h.bf16 %v236_v6  ;;  %v239_v48 = vld [vmem:[%s403_s0 + $0x30] sm:$0xff]   ;;  %v240_v55 = vld [vmem:[%s403_s0 + $0x38] sm:$0xff]  }
   0x4   :  { %v61_v12 = vmul.f32 %v196_v2, %v269_v1  ;;  %v62_v13 = vmul.f32 %v197_v3, %v269_v1  ;;  %v63_v16 = vmul.f32 %v200_v8, %v269_v1  ;;  %v64_v17 = vmul.f32 %v201_v9, %v269_v1  ;;  %v237_v28 = vld [vmem:[%s403_s0 + $0x20] sm:$0xff]  }
   0x5   :  { %v65_v18 = vmul.f32 %v204_v10, %v269_v1  ;;  %v66_v19 = vmul.f32 %v205_v11, %v269_v1  ;;  %v67_v22 = vmul.f32 %v208_v14, %v269_v1  ;;  %v68_v23 = vmul.f32 %v209_v15, %v269_v1  ;;  %v241_v14 = vld [vmem:[%s403_s0 + $0x40] sm:$0xff]  }
   0x6   :  { %v88_v20 = vadd.f32 %v283_v7, %v61_v12  ;;  %v89_v21 = vadd.f32 %v283_v7, %v62_v13  ;;  %v90_v24 = vadd.f32 %v283_v7, %v63_v16  ;;  %v91_v25 = vadd.f32 %v283_v7, %v64_v17 }
   0x7   :  { %v92_v26 = vadd.f32 %v283_v7, %v65_v18  ;;  %v93_v27 = vadd.f32 %v283_v7, %v66_v19  ;;  %v94_v41 = vadd.f32 %v283_v7, %v67_v22  ;;  %v95_v42 = vadd.f32 %v283_v7, %v68_v23  ;;  %v242_v19 = vld [vmem:[%s403_s0 + $0x48] sm:$0xff]  }
   0x8   :  { %vm108_vm0 = vcmp.gt.f32.partialorder %v88_v20, 0.0  ;;  %v128_v29 = vmul.f32 0.2, %v88_v20  ;;  %vm109_vm1 = vcmp.gt.f32.partialorder %v89_v21, 0.0  ;;  %v129_v30 = vmul.f32 0.2, %v89_v21 }
   0x9   :  { %vm110_vm2 = vcmp.gt.f32.partialorder %v90_v24, 0.0  ;;  %v130_v31 = vmul.f32 0.2, %v90_v24  ;;  %vm111_vm3 = vcmp.gt.f32.partialorder %v91_v25, 0.0  ;;  %v131_v32 = vmul.f32 0.2, %v91_v25 }
   0xa   :  { %v148_v33 = vsel %vm108_vm0, %v88_v20, %v128_v29  ;;  %v149_v34 = vsel %vm109_vm1, %v89_v21, %v129_v30  ;;  %vm112_vm4 = vcmp.gt.f32.partialorder %v92_v26, 0.0  ;;  %v132_v35 = vmul.f32 0.2, %v92_v26 }
   0xb   :  { %168 = vst [vmem:[%s406_s3] sm:$0xff] %v148_v33  ;;  %169 = vst [vmem:[%s406_s3 + $0x8] sm:$0xff] %v149_v34  ;;  %v150_v37 = vsel %vm110_vm2, %v90_v24, %v130_v31  ;;  %v151_v38 = vsel %vm111_vm3, %v91_v25, %v131_v32  ;;  %vm113_vm5 = vcmp.gt.f32.partialorder %v93_v27, 0.0  ;;  %v133_v39 = vmul.f32 0.2, %v93_v27 }
   0xc   :  { %170 = vst [vmem:[%s406_s3 + $0x10] sm:$0xff] %v150_v37  ;;  %171 = vst [vmem:[%s406_s3 + $0x18] sm:$0xff] %v151_v38  ;;  %v152_v40 = vsel %vm112_vm4, %v92_v26, %v132_v35  ;;  %v212_v43 = vunpack.c.l.bf16 %v237_v28  ;;  %v213_v45 = vunpack.c.h.bf16 %v237_v28  ;;  %v216_v46 = vunpack.c.l.bf16 %v238_v36 }
   0xd   :  { %172 = vst [vmem:[%s406_s3 + $0x20] sm:$0xff] %v152_v40  ;;  %v153_v44 = vsel %vm113_vm5, %v93_v27, %v133_v39  ;;  %v217_v47 = vunpack.c.h.bf16 %v238_v36  ;;  %vm114_vm6 = vcmp.gt.f32.partialorder %v94_v41, 0.0  ;;  %v134_v49 = vmul.f32 0.2, %v94_v41 }
   0xe   :  { %173 = vst [vmem:[%s406_s3 + $0x28] sm:$0xff] %v153_v44  ;;  %vm115_vm7 = vcmp.gt.f32.partialorder %v95_v42, 0.0  ;;  %v135_v50 = vmul.f32 0.2, %v95_v42  ;;  %v69_v51 = vmul.f32 %v212_v43, %v269_v1  ;;  %v70_v52 = vmul.f32 %v213_v45, %v269_v1 }
   0xf   :  { %v71_v53 = vmul.f32 %v216_v46, %v269_v1  ;;  %v72_v54 = vmul.f32 %v217_v47, %v269_v1  ;;  %v154_v56 = vsel %vm114_vm6, %v94_v41, %v134_v49  ;;  %v220_v58 = vunpack.c.l.bf16 %v239_v48 }
  0x10   :  { %v155_v57 = vsel %vm115_vm7, %v95_v42, %v135_v50  ;;  %v221_v59 = vunpack.c.h.bf16 %v239_v48  ;;  %174 = vst [vmem:[%s406_s3 + $0x30] sm:$0xff] %v154_v56  ;;  %v96_v60 = vadd.f32 %v283_v7, %v69_v51  ;;  %v97_v61 = vadd.f32 %v283_v7, %v70_v52 }
  0x11   :  { %175 = vst [vmem:[%s406_s3 + $0x38] sm:$0xff] %v155_v57  ;;  %v98_v62 = vadd.f32 %v283_v7, %v71_v53  ;;  %v99_v63 = vadd.f32 %v283_v7, %v72_v54  ;;  %v73_v0 = vmul.f32 %v220_v58, %v269_v1  ;;  %v224_v3 = vunpack.c.l.bf16 %v240_v55 }
  0x12   :  { %v74_v2 = vmul.f32 %v221_v59, %v269_v1  ;;  %v225_v4 = vunpack.c.h.bf16 %v240_v55  ;;  %vm116_vm8 = vcmp.gt.f32.partialorder %v96_v60, 0.0  ;;  %v136_v5 = vmul.f32 0.2, %v96_v60 }
  0x13   :  { %vm117_vm9 = vcmp.gt.f32.partialorder %v97_v61, 0.0  ;;  %v137_v6 = vmul.f32 0.2, %v97_v61  ;;  %vm118_vm10 = vcmp.gt.f32.partialorder %v98_v62, 0.0  ;;  %v138_v8 = vmul.f32 0.2, %v98_v62 }
  0x14   :  { %vm119_vm11 = vcmp.gt.f32.partialorder %v99_v63, 0.0  ;;  %v139_v9 = vmul.f32 0.2, %v99_v63  ;;  %v156_v10 = vsel %vm116_vm8, %v96_v60, %v136_v5  ;;  %v100_v12 = vadd.f32 %v283_v7, %v73_v0 }
  0x15   :  { %v157_v11 = vsel %vm117_vm9, %v97_v61, %v137_v6  ;;  %v101_v13 = vadd.f32 %v283_v7, %v74_v2  ;;  %176 = vst [vmem:[%s406_s3 + $0x40] sm:$0xff] %v156_v10  ;;  %v158_v15 = vsel %vm118_vm10, %v98_v62, %v138_v8  ;;  %v75_v17 = vmul.f32 %v224_v3, %v269_v1 }
  0x16   :  { %177 = vst [vmem:[%s406_s3 + $0x48] sm:$0xff] %v157_v11  ;;  %v159_v16 = vsel %vm119_vm11, %v99_v63, %v139_v9  ;;  %v76_v18 = vmul.f32 %v225_v4, %v269_v1  ;;  %178 = vst [vmem:[%s406_s3 + $0x50] sm:$0xff] %v158_v15  ;;  %vm120_vm12 = vcmp.gt.f32.partialorder %v100_v12, 0.0  ;;  %v140_v20 = vmul.f32 0.2, %v100_v12 }
  0x17   :  { %179 = vst [vmem:[%s406_s3 + $0x58] sm:$0xff] %v159_v16  ;;  %vm121_vm13 = vcmp.gt.f32.partialorder %v101_v13, 0.0  ;;  %v141_v21 = vmul.f32 0.2, %v101_v13  ;;  %v102_v22 = vadd.f32 %v283_v7, %v75_v17  ;;  %v228_v24 = vunpack.c.l.bf16 %v241_v14 }
  0x18   :  { %v103_v23 = vadd.f32 %v283_v7, %v76_v18  ;;  %v229_v25 = vunpack.c.h.bf16 %v241_v14  ;;  %v160_v26 = vsel %vm120_vm12, %v100_v12, %v140_v20  ;;  %v232_v28 = vunpack.c.l.bf16 %v242_v19 }
  0x19   :  { %v161_v27 = vsel %vm121_vm13, %v101_v13, %v141_v21  ;;  %v233_v29 = vunpack.c.h.bf16 %v242_v19  ;;  %180 = vst [vmem:[%s406_s3 + $0x60] sm:$0xff] %v160_v26  ;;  %vm122_vm14 = vcmp.gt.f32.partialorder %v102_v22, 0.0  ;;  %v142_v30 = vmul.f32 0.2, %v102_v22 }
  0x1a   :  { %181 = vst [vmem:[%s406_s3 + $0x68] sm:$0xff] %v161_v27  ;;  %vm123_vm15 = vcmp.gt.f32.partialorder %v103_v23, 0.0  ;;  %v143_v31 = vmul.f32 0.2, %v103_v23  ;;  %v77_v32 = vmul.f32 %v228_v24, %v269_v1  ;;  %v78_v33 = vmul.f32 %v229_v25, %v269_v1 }
  0x1b   :  { %v79_v34 = vmul.f32 %v232_v28, %v269_v1  ;;  %v80_v35 = vmul.f32 %v233_v29, %v269_v1  ;;  %v162_v36 = vsel %vm122_vm14, %v102_v22, %v142_v30 }
  0x1c   :  { %v163_v37 = vsel %vm123_vm15, %v103_v23, %v143_v31  ;;  %182 = vst [vmem:[%s406_s3 + $0x70] sm:$0xff] %v162_v36  ;;  %v104_v38 = vadd.f32 %v283_v7, %v77_v32  ;;  %v105_v39 = vadd.f32 %v283_v7, %v78_v33 }
  0x1d   :  { %183 = vst [vmem:[%s406_s3 + $0x78] sm:$0xff] %v163_v37  ;;  %v106_v40 = vadd.f32 %v283_v7, %v79_v34  ;;  %v107_v41 = vadd.f32 %v283_v7, %v80_v35 }
  0x1e   :  { %vm124_vm0 = vcmp.gt.f32.partialorder %v104_v38, 0.0  ;;  %v144_v1 = vmul.f32 0.2, %v104_v38  ;;  %vm125_vm1 = vcmp.gt.f32.partialorder %v105_v39, 0.0  ;;  %v145_v42 = vmul.f32 0.2, %v105_v39 }
  0x1f   :  { %vm126_vm2 = vcmp.gt.f32.partialorder %v106_v40, 0.0  ;;  %v146_v43 = vmul.f32 0.2, %v106_v40  ;;  %vm127_vm3 = vcmp.gt.f32.partialorder %v107_v41, 0.0  ;;  %v147_v44 = vmul.f32 0.2, %v107_v41 }
  0x20   :  { %v164_v45 = vsel %vm124_vm0, %v104_v38, %v144_v1  ;;  %v165_v46 = vsel %vm125_vm1, %v105_v39, %v145_v42 }
  0x21   :  { %184 = vst [vmem:[%s406_s3 + $0x80] sm:$0xff] %v164_v45  ;;  %185 = vst [vmem:[%s406_s3 + $0x88] sm:$0xff] %v165_v46  ;;  %v166_v47 = vsel %vm126_vm2, %v106_v40, %v146_v43  ;;  %v167_v7 = vsel %vm127_vm3, %v107_v41, %v147_v44 }
  0x22   :  { %186 = vst [vmem:[%s406_s3 + $0x90] sm:$0xff] %v166_v47  ;;  %187 = vst [vmem:[%s406_s3 + $0x98] sm:$0xff] %v167_v7 }

// kernel: conv_block_forward.2
= control target key start
LH: loop header
LB: loop body
LE: loop exit
PB: predicated region body
PF: predicated region fallthrough
CT: control target
= control target key end

     0   :  { %s2911_s15 = smov 0   ;;  %s3510_s0 = inlined_call_operand.vmem [shape: f32[2,384,128], index: 0, kind: input, shape index: {}]   ;;  %s3511_s1 = inlined_call_operand.vmem [shape: bf16[9,128,128], index: 1, kind: input, shape index: {}]   ;;  %s3512_s2 = inlined_call_operand.vmem [shape: f32[80,1], index: 2, kind: input, shape index: {}]   ;;  %s3513_s3 = inlined_call_operand.vmem [shape: bf16[160,128], index: 3, kind: output, shape index: {0}]   ;;  %s3514_s4 = inlined_call_operand.vmem [shape: f32[2,2,128], index: 4, kind: output, shape index: {1}]  }
   0x1 LB: > { %s2917_s16 = sadd.s32 4294967295, %s2881_s15   ;;  %p1931_p0 = scmp.ge.s32.totalorder %s2881_s15, 1  ;;  %s2881_s15 = sphi %s2911_s15, %s15_s15  }
   0x2   : > { %p165_p1 = scmp.lt.s32.totalorder %s2881_s15, 3 }
   0x4   : > { %p166_p2 = pnand %p1931_p0, %p165_p1 }
   0x5   : > { %v2803_v0 = vld [vmem:[%s3511_s1 + $0x40] sm:$0xff] (!%p166_p2)   ;;  %v2883_v1 = vmov (!%p166_p2), 0.0   ;;  %v2805_v3 = vld [vmem:[%s3511_s1 + $0x48] sm:$0xff] (!%p166_p2)   ;;  %vm2884_vm0 = vmmov (!%p166_p2), 0   ;;  %v2807_v5 = vld [vmem:[%s3511_s1 + $0x50] sm:$0xff] (!%p166_p2)   ;;  %p195_p3 = scmp.lt.s32.totalorder (!%p166_p2), %s2917_s16, 1 }
   0x6   : > { %169 = sbr.rel (%p166_p2) target bundleno = 494 (0x1ee), region = 32  ;;  %2303 = vmatprep.subr.bf16.mxu1 (!%p166_p2), %v2883_v1  ;;  %2447 = vmatprep.subr.bf16.mxu0 (!%p166_p2), %v2883_v1  ;;  %v2804_v2 = vld [vmem:[%s3511_s1 + $0x100] sm:$0xff] (!%p166_p2)   ;;  %v2806_v4 = vld [vmem:[%s3511_s1 + $0x108] sm:$0xff] (!%p166_p2)   ;;  %v2808_v6 = vld [vmem:[%s3511_s1 + $0x110] sm:$0xff] (!%p166_p2)  }
   0x7   : > { %2304 = vmatpush3.bf16.msra.mxu1 (!%p166_p2), %v2803_v0  ;;  %2319 = vmatprep.mubr.msk.bf16.mxu1 (!%p166_p2), %vm2884_vm0, %v2883_v1  ;;  %v2809_v7 = vld [vmem:[%s3511_s1 + $0x58] sm:$0xff] (!%p166_p2)   ;;  %v2811_v9 = vld [vmem:[%s3511_s1 + $0x60] sm:$0xff] (!%p166_p2)   ;;  %v2813_v11 = vld [vmem:[%s3511_s1 + $0x68] sm:$0xff] (!%p166_p2)  }
   0x8   : > { %2448 = vmatpush3.bf16.msra.mxu0 (!%p166_p2), %v2804_v2  ;;  %2305 = vmatprep.subr.bf16.mxu1 (!%p166_p2), %v2883_v1  ;;  %v2810_v8 = vld [vmem:[%s3511_s1 + $0x118] sm:$0xff] (!%p166_p2)   ;;  %v2812_v10 = vld [vmem:[%s3511_s1 + $0x120] sm:$0xff] (!%p166_p2)   ;;  %v2814_v12 = vld [vmem:[%s3511_s1 + $0x128] sm:$0xff] (!%p166_p2)  }
   0x9   : > { %2449 = vmatprep.subr.bf16.mxu0 (!%p166_p2), %v2883_v1  ;;  %2463 = vmatprep.mubr.msk.bf16.mxu0 (!%p166_p2), %vm2884_vm0, %v2883_v1  ;;  %v2815_v13 = vld [vmem:[%s3511_s1 + $0x70] sm:$0xff] (!%p166_p2)   ;;  %v2817_v15 = vld [vmem:[%s3511_s1 + $0x78] sm:$0xff] (!%p166_p2)   ;;  %v2819_v23 = vld [vmem:[%s3511_s1 + $0x140] sm:$0xff] (!%p166_p2)  }
   0xa   : > { %v2816_v14 = vld [vmem:[%s3511_s1 + $0x130] sm:$0xff] (!%p166_p2)   ;;  %v2818_v17 = vld [vmem:[%s3511_s1 + $0x138] sm:$0xff] (!%p166_p2)   ;;  %v2821_v24 = vld [vmem:[%s3511_s1] sm:$0xff] (!%p166_p2)  }
   0xb   : > { %2306 = vmatpush3.bf16.msra.mxu1 (!%p166_p2), %v2805_v3  ;;  %v2820_v25 = vld [vmem:[%s3511_s1 + $0x148] sm:$0xff] (!%p166_p2)   ;;  %v2822_v33 = vld [vmem:[%s3511_s1 + $0x150] sm:$0xff] (!%p166_p2)   ;;  %v2824_v39 = vld [vmem:[%s3511_s1 + $0x158] sm:$0xff] (!%p166_p2)  }
   0xc   : > { %2450 = vmatpush3.bf16.msra.mxu0 (!%p166_p2), %v2806_v4  ;;  %2307 = vmatprep.subr.bf16.mxu1 (!%p166_p2), %v2883_v1  ;;  %v2823_v30 = vld [vmem:[%s3511_s1 + $0x8] sm:$0xff] (!%p166_p2)   ;;  %v2825_v34 = vld [vmem:[%s3511_s1 + $0x10] sm:$0xff] (!%p166_p2)   ;;  %v2826_v40 = vld [vmem:[%s3511_s1 + $0x18] sm:$0xff] (!%p166_p2)  }
   0xd   : > { %2451 = vmatprep.subr.bf16.mxu0 %v2883_v1  ;;  %s2959_s7 = scalar_select %p195_p3, %s2917_s16, 1  ;;  %v2827_v43 = vld [vmem:[%s3511_s1 + $0x160] sm:$0xff]   ;;  %v2829_v49 = vld [vmem:[%s3511_s1 + $0x168] sm:$0xff]   ;;  %v2831_v53 = vld [vmem:[%s3511_s1 + $0x170] sm:$0xff]  }
   0xe   : > { %v2828_v45 = vld [vmem:[%s3511_s1 + $0x20] sm:$0xff]   ;;  %v2830_v50 = vld [vmem:[%s3511_s1 + $0x28] sm:$0xff]   ;;  %v2832_v54 = vld [vmem:[%s3511_s1 + $0x30] sm:$0xff]  }
   0xf   : > { %2308 = vmatpush3.bf16.msra.mxu1 %v2807_v5  ;;  %s2789_s12 = smul.u32 384, %s2959_s7  ;;  %v2833_v59 = vld [vmem:[%s3511_s1 + $0x178] sm:$0xff]   ;;  %s1934_s8 = sshll.u32 %s2959_s7, 1 }
  0x10   : > { %2452 = vmatpush3.bf16.msra.mxu0 %v2808_v6  ;;  %2309 = vmatprep.subr.bf16.mxu1 %v2883_v1  ;;  %v2834_v60 = vld [vmem:[%s3511_s1 + $0x38] sm:$0xff]   ;;  %v2835_v6 = vld [vmem:[%s3511_s1 + $0x180] sm:$0xff]   ;;  %s3492_s11 = scalar_lea.vmem %s3514_s4, %s1934_s8 }
  0x11   : > { %2453 = vmatprep.subr.bf16.mxu0 %v2883_v1  ;;  %s2981_s21 = scalar_lea.vmem %s3510_s0, %s2789_s12 }
  0x12   : > { %v242_v16 = vld [vmem:[%s2981_s21 + $0x60] sm:$0xff]  ;;  %v243_v18 = vld [vmem:[%s2981_s21 + $0x68] sm:$0xff]  ;;  %v244_v26 = vld [vmem:[%s2981_s21 + $0x70] sm:$0xff] }
  0x13   : > { %2310 = vmatpush3.bf16.msra.mxu1 %v2809_v7  ;;  %v842_v19 = vld [vmem:[%s2981_s21 + $0x120] sm:$0xff]  ;;  %v843_v20 = vld [vmem:[%s2981_s21 + $0x128] sm:$0xff]  ;;  %v252_v21 = vpack.c.bf16 %v243_v18, %v242_v16  ;;  %v245_v27 = vld [vmem:[%s2981_s21 + $0x78] sm:$0xff] }
  0x14   : > { %2454 = vmatpush3.bf16.msra.mxu0 %v2810_v8  ;;  %2311 = vmatprep.subr.bf16.mxu1 %v2883_v1  ;;  %v852_v22 = vpack.c.bf16 %v843_v20, %v842_v19  ;;  %v844_v28 = vld [vmem:[%s2981_s21 + $0x130] sm:$0xff]  ;;  %v845_v29 = vld [vmem:[%s2981_s21 + $0x138] sm:$0xff]  ;;  %v253_v31 = vpack.c.bf16 %v245_v27, %v244_v26  ;;  %v246_v35 = vld [vmem:[%s2981_s21 + $0x80] sm:$0xff] }
  0x15   : > { %2455 = vmatprep.subr.bf16.mxu0 %v2883_v1  ;;  %v853_v32 = vpack.c.bf16 %v845_v29, %v844_v28  ;;  %v247_v36 = vld [vmem:[%s2981_s21 + $0x88] sm:$0xff]  ;;  %v846_v37 = vld [vmem:[%s2981_s21 + $0x140] sm:$0xff]  ;;  %v248_v44 = vld [vmem:[%s2981_s21 + $0x90] sm:$0xff] }
  0x16   : > { %v847_v38 = vld [vmem:[%s2981_s21 + $0x148] sm:$0xff]  ;;  %v254_v41 = vpack.c.bf16 %v247_v36, %v246_v35  ;;  %v249_v46 = vld [vmem:[%s2981_s21 + $0x98] sm:$0xff]  ;;  %v848_v47 = vld [vmem:[%s2981_s21 + $0x150] sm:$0xff] }
  0x17   : > { %2312 = vmatpush3.bf16.msra.mxu1 %v2811_v9  ;;  %v854_v42 = vpack.c.bf16 %v847_v38, %v846_v37  ;;  %v849_v48 = vld [vmem:[%s2981_s21 + $0x158] sm:$0xff]  ;;  %v255_v51 = vpack.c.bf16 %v249_v46, %v248_v44  ;;  %v250_v55 = vld [vmem:[%s2981_s21 + $0xa0] sm:$0xff]  ;;  %v251_v56 = vld [vmem:[%s2981_s21 + $0xa8] sm:$0xff] }
  0x18   : > { %2456 = vmatpush3.bf16.msra.mxu0 %v2812_v10  ;;  %2313 = vmatprep.subr.bf16.mxu1 %v2883_v1  ;;  %v855_v52 = vpack.c.bf16 %v849_v48, %v848_v47  ;;  %v850_v57 = vld [vmem:[%s2981_s21 + $0x160] sm:$0xff]  ;;  %v851_v58 = vld [vmem:[%s2981_s21 + $0x168] sm:$0xff]  ;;  %v256_v61 = vpack.c.bf16 %v251_v56, %v250_v55  ;;  %v213_v7 = vld [vmem:[%s2981_s21 + $0x10] sm:$0xff] }
  0x19   : > { %2457 = vmatprep.subr.bf16.mxu0 %v2883_v1  ;;  %v856_v62 = vpack.c.bf16 %v851_v58, %v850_v57  ;;  %v211_v63 = vld [vmem:[%s2981_s21] sm:$0xff]  ;;  %v212_v0 = vld [vmem:[%s2981_s21 + $0x8] sm:$0xff]  ;;  %v214_v10 = vld [vmem:[%s2981_s21 + $0x18] sm:$0xff] }
  0x1a   : > { %v1005_v2 = vld [vmem:[%s2981_s21 + $0xc1] sm:$0xff]  ;;  %v1006_v3 = vld [vmem:[%s2981_s21 + $0xc9] sm:$0xff]  ;;  %v221_v4 = vpack.c.bf16 %v212_v0, %v211_v63  ;;  %v2850_v46 = vld [vmem:[%s3511_s1 + $0xb8] sm:$0xff]  }
  0x1b   : > { %2314 = vmatpush3.bf16.msra.mxu1 %v2813_v11  ;;  %v1015_v5 = vpack.c.bf16 %v1006_v3, %v1005_v2  ;;  %v2837_v8 = vld [vmem:[%s3511_s1 + $0x80] sm:$0xff]   ;;  %v2836_v9 = vld [vmem:[%s3511_s1 + $0x188] sm:$0xff]   ;;  %v1007_v11 = vld [vmem:[%s2981_s21 + $0xd1] sm:$0xff] }
  0x1c   : > { %2458 = vmatpush3.bf16.msra.mxu0 %v2814_v12  ;;  %2315 = vmatprep.subr.bf16.mxu1 %v2883_v1  ;;  %v1008_v12 = vld [vmem:[%s2981_s21 + $0xd9] sm:$0xff]  ;;  %v2838_v16 = vld [vmem:[%s3511_s1 + $0x190] sm:$0xff]   ;;  %v216_v19 = vld [vmem:[%s2981_s21 + $0x28] sm:$0xff] }
  0x1d   : > { %2459 = vmatprep.subr.bf16.mxu0 %v2883_v1  ;;  %v215_v18 = vld [vmem:[%s2981_s21 + $0x20] sm:$0xff]  ;;  %v217_v29 = vld [vmem:[%s2981_s21 + $0x30] sm:$0xff]  ;;  %v1662_v56 = vld [vmem:[%s3512_s2 + $0x28] sm:$0xff] }
  0x1e   : > { %v1009_v20 = vld [vmem:[%s2981_s21 + $0xe1] sm:$0xff]  ;;  %v2847_v37 = vld [vmem:[%s3511_s1 + $0x1b0] sm:$0xff]   ;;  %v1664_v0 = vld [vmem:[%s3512_s2 + $0x38] sm:$0xff] }
  0x1f   : > { %2316 = vmatpush3.bf16.msra.mxu1 %v2815_v13  ;;  %v2839_v13 = vld [vmem:[%s3511_s1 + $0x88] sm:$0xff]   ;;  %v2843_v27 = vld [vmem:[%s3511_s1 + $0x1a0] sm:$0xff]   ;;  %v2848_v38 = vld [vmem:[%s3511_s1 + $0xb0] sm:$0xff]  }
  0x20   : > { %2460 = vmatpush3.bf16.msra.mxu0 %v2816_v14  ;;  %2317 = vmatprep.subr.bf16.mxu1 %v2883_v1  ;;  %v222_v14 = vpack.c.bf16 %v214_v10, %v213_v7  ;;  %v2844_v28 = vld [vmem:[%s3511_s1 + $0xa0] sm:$0xff]   ;;  %v2855_v2 = vld [vmem:[%s3511_s1 + $0xc8] sm:$0xff]   ;;  %v2856_v10 = vld [vmem:[%s3511_s1 + $0x1d8] sm:$0xff]  }
  0x21   : > { %2461 = vmatprep.subr.bf16.mxu0 %v2883_v1  ;;  %v1657_v44 = vld [vmem:[%s3512_s2] sm:$0xff]  ;;  %v521_v7 = vld [vmem:[%s2981_s21 + $0x29] sm:$0xff] }
  0x22   : > { %v2851_v58 = vld [vmem:[%s3511_s1 + $0x1c0] sm:$0xff]  }
  0x23   : > { %2318 = vmatpush3.bf16.msra.mxu1 %v2817_v15  ;;  %v1016_v15 = vpack.c.bf16 %v1008_v12, %v1007_v11  ;;  %v1171_v63 = vld [vmem:[%s2981_s21 + $0x21] sm:$0xff]  ;;  %v2858_v12 = vld [vmem:[%s3511_s1 + $0xd8] sm:$0xff]  }
  0x24   : > { %2462 = vmatpush3.bf16.msra.mxu0 %v2818_v17  ;;  %2339 = vmatprep.subr.bf16.mxu1 %v2883_v1  ;;  %v2841_v17 = vld [vmem:[%s3511_s1 + $0x90] sm:$0xff]   ;;  %v1666_v11 = vld [vmem:[%s3512_s2 + $0x48] sm:$0xff] }
  0x25   : > { %2483 = vmatprep.subr.bf16.mxu0 %v2883_v1 }
  0x26   : > { %2320 = vmatmul.mubr.bf16.vlgmr.msra.gmra.mrb[0].mxu1 %v252_v21  ;;  %v1010_v21 = vld [vmem:[%s2981_s21 + $0xe9] sm:$0xff] }
  0x27   : > { %2464 = vmatmul.mubr.bf16.vlgmr.msra.gmra.mrb[0].mxu0 %v852_v22  ;;  %2323 = vmatprep.mubr.msk.bf16.mxu1 %vm2884_vm0, %v2883_v1  ;;  %v2840_v22 = vld [vmem:[%s3511_s1 + $0x198] sm:$0xff]   ;;  %v1017_v26 = vpack.c.bf16 %v1010_v21, %v1009_v20  ;;  %v2862_v20 = vld [vmem:[%s3511_s1 + $0xe8] sm:$0xff]  }
  0x28   : > { %2484 = vmatpush3.bf16.msra.mxu0 %v2819_v23  ;;  %2467 = vmatprep.mubr.msk.bf16.mxu0 %vm2884_vm0, %v2883_v1  ;;  %v2842_v23 = vld [vmem:[%s3511_s1 + $0x98] sm:$0xff]  }
  0x29   : > { %2485 = vmatprep.subr.bf16.mxu0 %v2883_v1  ;;  %2340 = vmatpush3.bf16.msra.mxu1 %v2821_v24  ;;  %v223_v24 = vpack.c.bf16 %v216_v19, %v215_v18  ;;  %v1175_v18 = vld [vmem:[%s2981_s21 + $0x41] sm:$0xff] }
  0x2a   : > { %2341 = vmatprep.subr.bf16.mxu1 %v2883_v1  ;;  %v2861_v19 = vld [vmem:[%s3511_s1 + $0x1e8] sm:$0xff]  }
  0x2c   : > { %2486 = vmatpush3.bf16.msra.mxu0 %v2820_v25  ;;  %v2885_v25 = vmov 0  }
  0x2d   : > { %2487 = vmatprep.subr.bf16.mxu0 %v2883_v1  ;;  %2342 = vmatpush3.bf16.msra.mxu1 %v2823_v30  ;;  %v218_v30 = vld [vmem:[%s2981_s21 + $0x38] sm:$0xff] }
  0x2e   : > { %2324 = vmatmul.mubr.bf16.gmra.mrb[4].mxu1 %v253_v31  ;;  %2343 = vmatprep.subr.bf16.mxu1 %v2883_v1  ;;  %v1011_v31 = vld [vmem:[%s2981_s21 + $0xf1] sm:$0xff]  ;;  %v224_v35 = vpack.c.bf16 %v218_v30, %v217_v29 }
  0x2f   : > { %2468 = vmatmul.mubr.bf16.gmra.mrb[4].mxu0 %v853_v32  ;;  %2327 = vmatprep.mubr.msk.bf16.mxu1 %vm2884_vm0, %v2883_v1  ;;  %v1012_v32 = vld [vmem:[%s2981_s21 + $0xf9] sm:$0xff] }
  0x30   : > { %2488 = vmatpush3.bf16.msra.mxu0 %v2822_v33  ;;  %2471 = vmatprep.mubr.msk.bf16.mxu0 %vm2884_vm0, %v2883_v1  ;;  %v2845_v33 = vld [vmem:[%s3511_s1 + $0x1a8] sm:$0xff]   ;;  %v1018_v36 = vpack.c.bf16 %v1012_v32, %v1011_v31  ;;  %v679_v31 = vld [vmem:[%s2981_s21 + $0xc0] sm:$0xff] }
  0x31   : > { %2489 = vmatprep.subr.bf16.mxu0 %v2883_v1  ;;  %2344 = vmatpush3.bf16.msra.mxu1 %v2825_v34  ;;  %v2846_v34 = vld [vmem:[%s3511_s1 + $0xa8] sm:$0xff]  }
  0x32   : > { %2345 = vmatprep.subr.bf16.mxu1 %v2883_v1  ;;  %2801 = vset.pattern.permute.xlu0 %v2885_v25  ;;  %v680_v32 = vld [vmem:[%s2981_s21 + $0xc8] sm:$0xff] }
  0x33   : > { %2802 = vset.pattern.permute.xlu1 %v2885_v25  ;;  %1669 = vperm.xlu0 %2801, %v1657_v44   ;;  %v525_v25 = vld [vmem:[%s2981_s21 + $0x49] sm:$0xff] }
  0x34   : > { %2490 = vmatpush3.bf16.msra.mxu0 %v2824_v39  ;;  %v219_v39 = vld [vmem:[%s2981_s21 + $0x40] sm:$0xff]  ;;  %v530_v29 = vpack.c.bf16 %v525_v25, %v1175_v18 }
  0x35   : > { %2491 = vmatprep.subr.bf16.mxu0 %v2883_v1  ;;  %2346 = vmatpush3.bf16.msra.mxu1 %v2826_v40  ;;  %v220_v40 = vld [vmem:[%s2981_s21 + $0x48] sm:$0xff] }
  0x36   : > { %2328 = vmatmul.mubr.bf16.gmra.mrb[8].mxu1 %v254_v41  ;;  %2347 = vmatprep.subr.bf16.mxu1 %v2883_v1  ;;  %v1013_v41 = vld [vmem:[%s2981_s21 + $0x101] sm:$0xff]  ;;  %v225_v47 = vpack.c.bf16 %v220_v40, %v219_v39  ;;  %v682_v39 = vld [vmem:[%s2981_s21 + $0xd8] sm:$0xff] }
  0x37   : > { %2472 = vmatmul.mubr.bf16.gmra.mrb[8].mxu0 %v854_v42  ;;  %2331 = vmatprep.mubr.msk.bf16.mxu1 %vm2884_vm0, %v2883_v1  ;;  %v1014_v42 = vld [vmem:[%s2981_s21 + $0x109] sm:$0xff] }
  0x38   : > { %2492 = vmatpush3.bf16.msra.mxu0 %v2827_v43  ;;  %2475 = vmatprep.mubr.msk.bf16.mxu0 %vm2884_vm0, %v2883_v1  ;;  %v2849_v43 = vld [vmem:[%s3511_s1 + $0x1b8] sm:$0xff]   ;;  %v1019_v48 = vpack.c.bf16 %v1014_v42, %v1013_v41  ;;  %v2868_v40 = vld [vmem:[%s3511_s1 + $0x208] sm:$0xff]  }
  0x39   : > { %2348 = vmatpush3.bf16.msra.mxu1 %v2828_v45  ;;  %2493 = vmatprep.subr.bf16.mxu0 %v2883_v1  ;;  %v1659_v45 = vld [vmem:[%s3512_s2 + $0x10] sm:$0xff]  ;;  %v1333_v41 = vld [vmem:[%s2981_s21 + $0x79] sm:$0xff]  ;;  %v1334_v42 = vld [vmem:[%s2981_s21 + $0x81] sm:$0xff] }
  0x3a   : > { %2349 = vmatprep.subr.bf16.mxu1 %v2883_v1  ;;  %1679 = vperm.xlu1 %2802, %v1659_v45   ;;  %v1342_v44 = vpack.c.bf16 %v1334_v42, %v1333_v41  ;;  %v2869_v45 = vld [vmem:[%s3511_s1 + $0x210] sm:$0xff]  }
  0x3c   : > { %2494 = vmatpush3.bf16.msra.mxu0 %v2829_v49  ;;  %v1658_v49 = vld [vmem:[%s3512_s2 + $0x8] sm:$0xff] }
  0x3d   : > { %2350 = vmatpush3.bf16.msra.mxu1 %v2830_v50  ;;  %2495 = vmatprep.subr.bf16.mxu0 %v2883_v1  ;;  %v1660_v50 = vld [vmem:[%s3512_s2 + $0x18] sm:$0xff] }
  0x3e   : > { %2332 = vmatmul.mubr.bf16.gmra.mrb[12].mxu1 %v255_v51  ;;  %2351 = vmatprep.subr.bf16.mxu1 %v2883_v1  ;;  %v516_v51 = vld [vmem:[%s2981_s21 + $0x1] sm:$0xff] }
  0x3f   : > { %2476 = vmatmul.mubr.bf16.gmra.mrb[12].mxu0 %v855_v52  ;;  %2335 = vmatprep.mubr.msk.bf16.mxu1 %vm2884_vm0, %v2883_v1  ;;  %v517_v52 = vld [vmem:[%s2981_s21 + $0x9] sm:$0xff] }
  0x40   : > { %2479 = vmatprep.mubr.msk.bf16.mxu0 %vm2884_vm0, %v2883_v1  ;;  %2496 = vmatpush3.bf16.msra.mxu0 %v2831_v53  ;;  %v1169_v53 = vld [vmem:[%s2981_s21 + $0x11] sm:$0xff]  ;;  %v526_v55 = vpack.c.bf16 %v517_v52, %v516_v51 }
  0x41   : > { %2352 = vmatpush3.bf16.msra.mxu1 %v2832_v54  ;;  %2497 = vmatprep.subr.bf16.mxu0 %v2883_v1  ;;  %v1661_v54 = vld [vmem:[%s3512_s2 + $0x20] sm:$0xff]  ;;  %v1178_v57 = vpack.c.bf16 %v1169_v53, %v517_v52 }
  0x42   : > { %2353 = vmatprep.subr.bf16.mxu1 %v2883_v1  ;;  %1674 = vperm.xlu0 %2801, %v1658_v49   ;;  %v1336_v49 = vld [vmem:[%s2981_s21 + $0x91] sm:$0xff] }
  0x43   : > { %1684 = vperm.xlu1 %2802, %v1660_v50   ;;  %v2870_v50 = vld [vmem:[%s3511_s1 + $0x218] sm:$0xff]  }
  0x44   : > { %2498 = vmatpush3.bf16.msra.mxu0 %v2833_v59  ;;  %v2853_v59 = vld [vmem:[%s3511_s1 + $0xc0] sm:$0xff]  }
  0x45   : > { %2354 = vmatpush3.bf16.msra.mxu1 %v2834_v60  ;;  %2519 = vmatprep.subr.bf16.mxu0 %v2883_v1  ;;  %v519_v60 = vld [vmem:[%s2981_s21 + $0x19] sm:$0xff] }
  0x46   : > { %2336 = vmatmul.mubr.bf16.gmra.mrb[16].mxu1 %v256_v61  ;;  %2375 = vmatprep.subr.bf16.mxu1 %v2883_v1  ;;  %v1663_v61 = vld [vmem:[%s3512_s2 + $0x30] sm:$0xff]  ;;  %v527_v3 = vpack.c.bf16 %v519_v60, %v1169_v53  ;;  %v2871_v53 = vld [vmem:[%s3511_s1 + $0x220] sm:$0xff]  }
  0x47   : > { %2480 = vmatmul.mubr.bf16.gmra.mrb[16].mxu0 %v856_v62  ;;  %2355 = vmatprep.mubr.msk.bf16.mxu1 %vm2884_vm0, %v2883_v1  ;;  %v2852_v62 = vld [vmem:[%s3511_s1 + $0x1c8] sm:$0xff]  }
  0x48   : > { %2499 = vmatprep.mubr.msk.bf16.mxu0 %vm2884_vm0, %v2883_v1  ;;  %1689 = vperm.xlu0 %2801, %v1661_v54   ;;  %v685_v54 = vld [vmem:[%s2981_s21 + $0xf0] sm:$0xff] }
  0x49   : > { %1694 = vperm.xlu1 %2802, %v1662_v56   ;;  %v1337_v56 = vld [vmem:[%s2981_s21 + $0x99] sm:$0xff] }
  0x4c   : > { %1699 = vperm.xlu0 %2801, %v1663_v61   ;;  %v2873_v61 = vld [vmem:[%s3511_s1 + $0x230] sm:$0xff]  }
  0x4d   : > { %1704 = vperm.xlu1 %2802, %v1664_v0   ;;  %v1339_v0 = vld [vmem:[%s2981_s21 + $0xa9] sm:$0xff] }
  0x4e   : > { %2356 = vmatmul.mubr.bf16.vlgmr.msra.gmra.mrb[0].mxu1 %v221_v4  ;;  %v1179_v4 = vpack.c.bf16 %v1171_v63, %v519_v60 }
  0x4f   : > { %2500 = vmatmul.mubr.bf16.vlgmr.msra.gmra.mrb[0].mxu0 %v1015_v5  ;;  %2359 = vmatprep.mubr.msk.bf16.mxu1 %vm2884_vm0, %v2883_v1  ;;  %v2854_v5 = vld [vmem:[%s3511_s1 + $0x1d0] sm:$0xff]  }
  0x50   : > { %2520 = vmatpush3.bf16.msra.mxu0 %v2835_v6  ;;  %2503 = vmatprep.mubr.msk.bf16.mxu0 %vm2884_vm0, %v2883_v1  ;;  %v2857_v6 = vld [vmem:[%s3511_s1 + $0xd0] sm:$0xff]  }
  0x51   : > { %2521 = vmatprep.subr.bf16.mxu0 %v2883_v1  ;;  %2376 = vmatpush3.bf16.msra.mxu1 %v2837_v8  ;;  %v1665_v8 = vld [vmem:[%s3512_s2 + $0x40] sm:$0xff] }
  0x52   : > { %2377 = vmatprep.subr.bf16.mxu1 %v2883_v1  ;;  %1709 = vperm.xlu0 %2801, %v1665_v8   ;;  %v1494_v8 = vld [vmem:[%s2981_s21 + $0xa] sm:$0xff] }
  0x53   : > { %1714 = vperm.xlu1 %2802, %v1666_v11  }
  0x54   : > { %2522 = vmatpush3.bf16.msra.mxu0 %v2836_v9  ;;  %v1173_v9 = vld [vmem:[%s2981_s21 + $0x31] sm:$0xff] }
  0x55   : > { %2523 = vmatprep.subr.bf16.mxu0 %v2883_v1  ;;  %2378 = vmatpush3.bf16.msra.mxu1 %v2839_v13  ;;  %v528_v13 = vpack.c.bf16 %v521_v7, %v1171_v63  ;;  %v688_v63 = vld [vmem:[%s2981_s21 + $0x108] sm:$0xff] }
  0x56   : > { %2360 = vmatmul.mubr.bf16.gmra.mrb[4].mxu1 %v222_v14  ;;  %2379 = vmatprep.subr.bf16.mxu1 %v2883_v1  ;;  %v1180_v14 = vpack.c.bf16 %v1173_v9, %v521_v7  ;;  %v1501_v7 = vld [vmem:[%s2981_s21 + $0x42] sm:$0xff] }
  0x57   : > { %2504 = vmatmul.mubr.bf16.gmra.mrb[4].mxu0 %v1016_v15  ;;  %2363 = vmatprep.mubr.msk.bf16.mxu1 %vm2884_vm0, %v2883_v1  ;;  %v2859_v15 = vld [vmem:[%s3511_s1 + $0x1e0] sm:$0xff]  }
  0x58   : > { %2524 = vmatpush3.bf16.msra.mxu0 %v2838_v16  ;;  %2507 = vmatprep.mubr.msk.bf16.mxu0 %vm2884_vm0, %v2883_v1  ;;  %v2860_v16 = vld [vmem:[%s3511_s1 + $0xe0] sm:$0xff]  }
  0x59   : > { %2525 = vmatprep.subr.bf16.mxu0 %v2883_v1  ;;  %2380 = vmatpush3.bf16.msra.mxu1 %v2841_v17  ;;  %v523_v17 = vld [vmem:[%s2981_s21 + $0x39] sm:$0xff] }
  0x5a   : > { %2381 = vmatprep.subr.bf16.mxu1 %v2883_v1  ;;  %v529_v21 = vpack.c.bf16 %v523_v17, %v1173_v9  ;;  %v1495_v9 = vld [vmem:[%s2981_s21 + $0x12] sm:$0xff] }
  0x5b   : > { %v1504_v11 = vpack.c.bf16 %v1495_v9, %v1494_v8 }
  0x5c   : > { %2526 = vmatpush3.bf16.msra.mxu0 %v2840_v22  ;;  %v1181_v22 = vpack.c.bf16 %v1175_v18, %v523_v17  ;;  %v1498_v18 = vld [vmem:[%s2981_s21 + $0x2a] sm:$0xff] }
  0x5d   : > { %2527 = vmatprep.subr.bf16.mxu0 %v2883_v1  ;;  %2382 = vmatpush3.bf16.msra.mxu1 %v2842_v23  ;;  %v2863_v23 = vld [vmem:[%s3511_s1 + $0x1f0] sm:$0xff]  }
  0x5e   : > { %2364 = vmatmul.mubr.bf16.gmra.mrb[8].mxu1 %v223_v24  ;;  %2383 = vmatprep.subr.bf16.mxu1 %v2883_v1  ;;  %v2864_v24 = vld [vmem:[%s3511_s1 + $0xf0] sm:$0xff]  }
  0x5f   : > { %2508 = vmatmul.mubr.bf16.gmra.mrb[8].mxu0 %v1017_v26  ;;  %2367 = vmatprep.mubr.msk.bf16.mxu1 %vm2884_vm0, %v2883_v1  ;;  %v1177_v26 = vld [vmem:[%s2981_s21 + $0x51] sm:$0xff] }
  0x60   : > { %2528 = vmatpush3.bf16.msra.mxu0 %v2843_v27  ;;  %2511 = vmatprep.mubr.msk.bf16.mxu0 %vm2884_vm0, %v2883_v1  ;;  %v2865_v27 = vld [vmem:[%s3511_s1 + $0x1f8] sm:$0xff]   ;;  %v1182_v30 = vpack.c.bf16 %v1177_v26, %v525_v25 }
  0x61   : > { %2384 = vmatpush3.bf16.msra.mxu1 %v2844_v28  ;;  %2529 = vmatprep.subr.bf16.mxu0 %v2883_v1  ;;  %v2866_v28 = vld [vmem:[%s3511_s1 + $0xf8] sm:$0xff]  }
  0x62   : > { %2385 = vmatprep.subr.bf16.mxu1 %v2883_v1 }
  0x64   : > { %2530 = vmatpush3.bf16.msra.mxu0 %v2845_v33  ;;  %v1331_v33 = vld [vmem:[%s2981_s21 + $0x69] sm:$0xff] }
  0x65   : > { %2386 = vmatpush3.bf16.msra.mxu1 %v2846_v34  ;;  %2531 = vmatprep.subr.bf16.mxu0 %v2883_v1  ;;  %v1332_v34 = vld [vmem:[%s2981_s21 + $0x71] sm:$0xff] }
  0x66   : > { %2368 = vmatmul.mubr.bf16.gmra.mrb[12].mxu1 %v224_v35  ;;  %2387 = vmatprep.subr.bf16.mxu1 %v2883_v1  ;;  %v689_v35 = vpack.c.bf16 %v680_v32, %v679_v31 }
  0x67   : > { %2512 = vmatmul.mubr.bf16.gmra.mrb[12].mxu0 %v1018_v36  ;;  %2371 = vmatprep.mubr.msk.bf16.mxu1 %vm2884_vm0, %v2883_v1  ;;  %v1341_v36 = vpack.c.bf16 %v1332_v34, %v1331_v33 }
  0x68   : > { %2515 = vmatprep.mubr.msk.bf16.mxu0 %vm2884_vm0, %v2883_v1  ;;  %2532 = vmatpush3.bf16.msra.mxu0 %v2847_v37  ;;  %v2867_v37 = vld [vmem:[%s3511_s1 + $0x200] sm:$0xff]  }
  0x69   : > { %2388 = vmatpush3.bf16.msra.mxu1 %v2848_v38  ;;  %2533 = vmatprep.subr.bf16.mxu0 %v2883_v1  ;;  %v681_v38 = vld [vmem:[%s2981_s21 + $0xd0] sm:$0xff] }
  0x6a   : > { %2389 = vmatprep.subr.bf16.mxu1 %v2883_v1 }
  0x6c   : > { %2534 = vmatpush3.bf16.msra.mxu0 %v2849_v43  ;;  %v690_v43 = vpack.c.bf16 %v682_v39, %v681_v38 }
  0x6d   : > { %2390 = vmatpush3.bf16.msra.mxu1 %v2850_v46  ;;  %2555 = vmatprep.subr.bf16.mxu0 %v2883_v1  ;;  %v683_v46 = vld [vmem:[%s2981_s21 + $0xe0] sm:$0xff] }
  0x6e   : > { %2372 = vmatmul.mubr.bf16.gmra.mrb[16].mxu1 %v225_v47  ;;  %2411 = vmatprep.subr.bf16.mxu1 %v2883_v1  ;;  %v684_v47 = vld [vmem:[%s2981_s21 + $0xe8] sm:$0xff] }
  0x6f   : > { %2516 = vmatmul.mubr.bf16.gmra.mrb[16].mxu0 %v1019_v48  ;;  %2391 = vmatprep.mubr.msk.bf16.mxu1 %vm2884_vm0, %v2883_v1  ;;  %v1335_v48 = vld [vmem:[%s2981_s21 + $0x89] sm:$0xff]  ;;  %v691_v51 = vpack.c.bf16 %v684_v47, %v683_v46 }
  0x70   : > { %2535 = vmatprep.mubr.msk.bf16.mxu0 %vm2884_vm0, %v2883_v1  ;;  %v1343_v52 = vpack.c.bf16 %v1336_v49, %v1335_v48 }
  0x76   : > { %2392 = vmatmul.mubr.bf16.vlgmr.msra.gmra.mrb[0].mxu1 %v526_v55  ;;  %v686_v55 = vld [vmem:[%s2981_s21 + $0xf8] sm:$0xff] }
  0x77   : > { %2536 = vmatmul.mubr.bf16.vlgmr.msra.gmra.mrb[0].mxu0 %v1178_v57  ;;  %2395 = vmatprep.mubr.msk.bf16.mxu1 %vm2884_vm0, %v2883_v1  ;;  %v1338_v57 = vld [vmem:[%s2981_s21 + $0xa1] sm:$0xff] }
  0x78   : > { %2556 = vmatpush3.bf16.msra.mxu0 %v2851_v58  ;;  %2539 = vmatprep.mubr.msk.bf16.mxu0 %vm2884_vm0, %v2883_v1  ;;  %v2872_v58 = vld [vmem:[%s3511_s1 + $0x228] sm:$0xff]   ;;  %v1344_v60 = vpack.c.bf16 %v1338_v57, %v1337_v56 }
  0x79   : > { %2557 = vmatprep.subr.bf16.mxu0 %v2883_v1  ;;  %2412 = vmatpush3.bf16.msra.mxu1 %v2853_v59  ;;  %v692_v59 = vpack.c.bf16 %v686_v55, %v685_v54 }
  0x7a   : > { %2413 = vmatprep.subr.bf16.mxu1 %v2883_v1 }
  0x7c   : > { %2558 = vmatpush3.bf16.msra.mxu0 %v2852_v62  ;;  %v687_v62 = vld [vmem:[%s2981_s21 + $0x100] sm:$0xff] }
  0x7d   : > { %2559 = vmatprep.subr.bf16.mxu0 %v2883_v1  ;;  %2414 = vmatpush3.bf16.msra.mxu1 %v2855_v2  ;;  %v1340_v2 = vld [vmem:[%s2981_s21 + $0xb1] sm:$0xff] }
  0x7e   : > { %2396 = vmatmul.mubr.bf16.gmra.mrb[4].mxu1 %v527_v3  ;;  %2415 = vmatprep.subr.bf16.mxu1 %v2883_v1  ;;  %v2874_v3 = vld [vmem:[%s3511_s1 + $0x238] sm:$0xff]  }
  0x7f   : > { %2540 = vmatmul.mubr.bf16.gmra.mrb[4].mxu0 %v1179_v4  ;;  %2399 = vmatprep.mubr.msk.bf16.mxu1 %vm2884_vm0, %v2883_v1  ;;  %v693_v4 = vpack.c.bf16 %v688_v63, %v687_v62 }
  0x80   : > { %2560 = vmatpush3.bf16.msra.mxu0 %v2854_v5  ;;  %2543 = vmatprep.mubr.msk.bf16.mxu0 %vm2884_vm0, %v2883_v1  ;;  %v1345_v5 = vpack.c.bf16 %v1340_v2, %v1339_v0 }
  0x81   : > { %2561 = vmatprep.subr.bf16.mxu0 %v2883_v1  ;;  %2416 = vmatpush3.bf16.msra.mxu1 %v2857_v6  ;;  %v1500_v6 = vld [vmem:[%s2981_s21 + $0x3a] sm:$0xff] }
  0x82   : > { %2417 = vmatprep.subr.bf16.mxu1 %v2883_v1 }
  0x84   : > { %2562 = vmatpush3.bf16.msra.mxu0 %v2856_v10  ;;  %v1507_v10 = vpack.c.bf16 %v1501_v7, %v1500_v6 }
  0x85   : > { %2563 = vmatprep.subr.bf16.mxu0 %v2883_v1  ;;  %2418 = vmatpush3.bf16.msra.mxu1 %v2858_v12  ;;  %v1502_v12 = vld [vmem:[%s2981_s21 + $0x4a] sm:$0xff] }
  0x86   : > { %2400 = vmatmul.mubr.bf16.gmra.mrb[8].mxu1 %v528_v13  ;;  %2419 = vmatprep.subr.bf16.mxu1 %v2883_v1  ;;  %v1503_v13 = vld [vmem:[%s2981_s21 + $0x52] sm:$0xff] }
  0x87   : > { %2544 = vmatmul.mubr.bf16.gmra.mrb[8].mxu0 %v1180_v14  ;;  %2403 = vmatprep.mubr.msk.bf16.mxu1 %vm2884_vm0, %v2883_v1  ;;  %v1496_v14 = vld [vmem:[%s2981_s21 + $0x1a] sm:$0xff] }
  0x88   : > { %2564 = vmatpush3.bf16.msra.mxu0 %v2859_v15  ;;  %2547 = vmatprep.mubr.msk.bf16.mxu0 %vm2884_vm0, %v2883_v1  ;;  %v1497_v15 = vld [vmem:[%s2981_s21 + $0x22] sm:$0xff] }
  0x89   : > { %2420 = vmatpush3.bf16.msra.mxu1 %v2860_v16  ;;  %2565 = vmatprep.subr.bf16.mxu0 %v2883_v1  ;;  %v1508_v16 = vpack.c.bf16 %v1503_v13, %v1502_v12  ;;  %v1505_v17 = vpack.c.bf16 %v1497_v15, %v1496_v14 }
  0x8a   : > { %2421 = vmatprep.subr.bf16.mxu1 %v2883_v1 }
  0x8c   : > { %2566 = vmatpush3.bf16.msra.mxu0 %v2861_v19  ;;  %v1499_v19 = vld [vmem:[%s2981_s21 + $0x32] sm:$0xff]  ;;  %s200_s21 = smul.u32 10, %s2917_s16 }
  0x8d   : > { %2422 = vmatpush3.bf16.msra.mxu1 %v2862_v20  ;;  %2567 = vmatprep.subr.bf16.mxu0 %v2883_v1  ;;  %v1506_v20 = vpack.c.bf16 %v1499_v19, %v1498_v18 }
  0x8e   : > { %2404 = vmatmul.mubr.bf16.gmra.mrb[12].mxu1 %v529_v21  ;;  %2423 = vmatprep.subr.bf16.mxu1 %v2883_v1  ;;  %p201_p4 = scmp.lt.s32.totalorder %s200_s21, 19 }
  0x8f   : > { %2548 = vmatmul.mubr.bf16.gmra.mrb[12].mxu0 %v1181_v22  ;;  %2407 = vmatprep.mubr.msk.bf16.mxu1 %vm2884_vm0, %v2883_v1 }
  0x90   : > { %2551 = vmatprep.mubr.msk.bf16.mxu0 %vm2884_vm0, %v2883_v1  ;;  %2568 = vmatpush3.bf16.msra.mxu0 %v2863_v23  ;;  %s3516_s21 = smov (!%p201_p4, %s200_s21), 19 }
  0x91   : > { %2424 = vmatpush3.bf16.msra.mxu1 %v2864_v24  ;;  %2569 = vmatprep.subr.bf16.mxu0 %v2883_v1  ;;  %s1933_s16 = sshll.u32 %s3516_s21, 2 }
  0x92   : > { %2425 = vmatprep.subr.bf16.mxu1 %v2883_v1  ;;  %s3448_s6 = scalar_lea.vmem %s3513_s3, %s1933_s16 }
  0x94   : > { %2570 = vmatpush3.bf16.msra.mxu0 %v2865_v27 }
  0x95   : > { %2426 = vmatpush3.bf16.msra.mxu1 %v2866_v28  ;;  %2591 = vmatprep.subr.bf16.mxu0 %v2883_v1 }
  0x96   : > { %2408 = vmatmul.mubr.bf16.gmra.mrb[16].mxu1 %v530_v29  ;;  %2627 = vmatprep.subr.bf16.mxu1 %v2883_v1 }
  0x97   : > { %2552 = vmatmul.mubr.bf16.gmra.mrb[16].mxu0 %v1182_v30  ;;  %2427 = vmatprep.mubr.msk.bf16.mxu1 %vm2884_vm0, %v2883_v1 }
  0x98   : > { %2571 = vmatprep.mubr.msk.bf16.mxu0 %vm2884_vm0, %v2883_v1 }
  0x9e   : > { %2428 = vmatmul.mubr.bf16.vlgmr.msra.gmra.mrb[0].mxu1 %v689_v35 }
  0x9f   : > { %2572 = vmatmul.mubr.bf16.vlgmr.msra.gmra.mrb[0].mxu0 %v1341_v36  ;;  %2431 = vmatprep.mubr.msk.bf16.mxu1 %vm2884_vm0, %v2883_v1 }
  0xa0   : > { %2592 = vmatpush3.bf16.msra.mxu0 %v2867_v37  ;;  %2575 = vmatprep.mubr.msk.bf16.mxu0 %vm2884_vm0, %v2883_v1 }
  0xa1   : > { %2593 = vmatprep.subr.bf16.mxu0 %v2883_v1  ;;  %2635 = vmatpush3.bf16.msra.mxu1 %v2867_v37 }
  0xa2   : > { %2628 = vmatprep.subr.bf16.mxu1 %v2883_v1 }
  0xa4   : > { %2594 = vmatpush3.bf16.msra.mxu0 %v2868_v40 }
  0xa5   : > { %2595 = vmatprep.subr.bf16.mxu0 %v2883_v1  ;;  %2636 = vmatpush3.bf16.msra.mxu1 %v2868_v40 }
  0xa6   : > { %2432 = vmatmul.mubr.bf16.gmra.mrb[4].mxu1 %v690_v43  ;;  %2629 = vmatprep.subr.bf16.mxu1 %v2883_v1 }
  0xa7   : > { %2576 = vmatmul.mubr.bf16.gmra.mrb[4].mxu0 %v1342_v44  ;;  %2435 = vmatprep.mubr.msk.bf16.mxu1 %vm2884_vm0, %v2883_v1 }
  0xa8   : > { %2596 = vmatpush3.bf16.msra.mxu0 %v2869_v45  ;;  %2579 = vmatprep.mubr.msk.bf16.mxu0 %vm2884_vm0, %v2883_v1 }
  0xa9   : > { %2597 = vmatprep.subr.bf16.mxu0 %v2883_v1  ;;  %2637 = vmatpush3.bf16.msra.mxu1 %v2869_v45 }
  0xaa   : > { %2630 = vmatprep.subr.bf16.mxu1 %v2883_v1 }
  0xac   : > { %2598 = vmatpush3.bf16.msra.mxu0 %v2870_v50 }
  0xad   : > { %2599 = vmatprep.subr.bf16.mxu0 %v2883_v1  ;;  %2638 = vmatpush3.bf16.msra.mxu1 %v2870_v50 }
  0xae   : > { %2436 = vmatmul.mubr.bf16.gmra.mrb[8].mxu1 %v691_v51  ;;  %2631 = vmatprep.subr.bf16.mxu1 %v2883_v1 }
  0xaf   : > { %2580 = vmatmul.mubr.bf16.gmra.mrb[8].mxu0 %v1343_v52  ;;  %2439 = vmatprep.mubr.msk.bf16.mxu1 %vm2884_vm0, %v2883_v1 }
  0xb0   : > { %2600 = vmatpush3.bf16.msra.mxu0 %v2871_v53  ;;  %2583 = vmatprep.mubr.msk.bf16.mxu0 %vm2884_vm0, %v2883_v1 }
  0xb1   : > { %2639 = vmatpush3.bf16.msra.mxu1 %v2871_v53  ;;  %2601 = vmatprep.subr.bf16.mxu0 %v2883_v1 }
  0xb2   : > { %2632 = vmatprep.subr.bf16.mxu1 %v2883_v1  ;;  %v3435_v52 = vpop.permute.xlu0 %1669 }
  0xb4   : > { %2602 = vmatpush3.bf16.msra.mxu0 %v2872_v58 }
  0xb5   : > { %2640 = vmatpush3.bf16.msra.mxu1 %v2872_v58  ;;  %2603 = vmatprep.subr.bf16.mxu0 %v2883_v1 }
  0xb6   : > { %2440 = vmatmul.mubr.bf16.gmra.mrb[12].mxu1 %v692_v59  ;;  %2633 = vmatprep.subr.bf16.mxu1 %v2883_v1 }
  0xb7   : > { %2584 = vmatmul.mubr.bf16.gmra.mrb[12].mxu0 %v1344_v60  ;;  %2443 = vmatprep.mubr.msk.bf16.mxu1 %vm2884_vm0, %v2883_v1 }
  0xb8   : > { %2587 = vmatprep.mubr.msk.bf16.mxu0 %vm2884_vm0, %v2883_v1  ;;  %2604 = vmatpush3.bf16.msra.mxu0 %v2873_v61 }
  0xb9   : > { %2641 = vmatpush3.bf16.msra.mxu1 %v2873_v61  ;;  %2605 = vmatprep.subr.bf16.mxu0 %v2883_v1  ;;  %v3437_v53 = vpop.permute.xlu1 %1679 }
  0xba   : > { %2634 = vmatprep.subr.bf16.mxu1 %v2883_v1 }
  0xbc   : > { %2606 = vmatpush3.bf16.msra.mxu0 %v2874_v3 }
  0xbd   : > { %2642 = vmatpush3.bf16.msra.mxu1 %v2874_v3 }
  0xbe   : > { %2444 = vmatmul.mubr.bf16.gmra.mrb[16].mxu1 %v693_v4 }
  0xbf   : > { %2588 = vmatmul.mubr.bf16.gmra.mrb[16].mxu0 %v1345_v5  ;;  %2619 = vmatprep.mubr.msk.bf16.mxu1 %vm2884_vm0, %v2883_v1 }
  0xc0   : > { %2607 = vmatprep.mubr.msk.bf16.mxu0 %vm2884_vm0, %v2883_v1 }
  0xc1   : > { %v3452_v3 = vpop.permute.xlu0 %1674 }
  0xc2   : > { %v3463_v8 = vpop.permute.xlu1 %1684 }
  0xc6   : > { %2620 = vmatmul.mubr.bf16.vlgmr.msra.gmra.mrb[20].mxu1 %v1507_v10 }
  0xc7   : > { %2608 = vmatmul.mubr.bf16.vlgmr.msra.gmra.mrb[0].mxu0 %v1504_v11  ;;  %2623 = vmatprep.mubr.msk.bf16.mxu1 %vm2884_vm0, %v2883_v1 }
  0xc8   : > { %2611 = vmatprep.mubr.msk.bf16.mxu0 %vm2884_vm0, %v2883_v1 }
  0xce   : > { %2624 = vmatmul.mubr.bf16.gmra.mrb[24].mxu1 %v1508_v16 }
  0xcf   : > { %2612 = vmatmul.mubr.bf16.gmra.mrb[4].mxu0 %v1505_v17 }
  0xd0   : > { %2615 = vmatprep.mubr.msk.bf16.mxu0 %vm2884_vm0, %v2883_v1 }
  0xd7   : > { %2616 = vmatmul.mubr.bf16.gmra.mrb[8].mxu0 %v1506_v20 }
 0x171   : > { %v793_v21 = vpop.f32.mrb[0].mxu1 }
 0x172   : > { %v2429_v22 = vpop.f32.mrb[1].mxu1 }
 0x173   : > { %v796_v23 = vpop.f32.mrb[2].mxu1 }
 0x174   : > { %v2430_v24 = vpop.f32.mrb[3].mxu1 }
 0x179   : > { %v801_v25 = vpop.f32.mrb[4].mxu1 }
 0x17a   : > { %v2433_v26 = vpop.f32.mrb[5].mxu1 }
 0x17b   : > { %v3428_v27 = vpop.f32.mrb[6].mxu1 }
 0x17c   : > { %v2434_v28 = vpop.f32.mrb[7].mxu1 }
 0x17d   : > { %v1690_v28 = vpop.permute.xlu0 %1689 }
 0x181   : > { %v3430_v29 = vpop.f32.mrb[8].mxu1 }
 0x182   : > { %v2437_v30 = vpop.f32.mrb[9].mxu1 }
 0x183   : > { %v3432_v31 = vpop.f32.mrb[10].mxu1 }
 0x184   : > { %v2438_v1 = vpop.f32.mrb[11].mxu1 }
 0x185   : > { %v1695_v1 = vpop.permute.xlu1 %1694 }
 0x189   : > { %v817_v32 = vpop.f32.mrb[12].mxu1 }
 0x18a   : > { %v1469_v33 = vpop.f32.mrb[12].mxu0  ;;  %v2441_v34 = vpop.f32.mrb[13].mxu1 }
 0x18b   : > { %v2649_v35 = vadd.f32 %v1469_v33, %v817_v32  ;;  %v2585_v36 = vpop.f32.mrb[13].mxu0  ;;  %v820_v37 = vpop.f32.mrb[14].mxu1 }
 0x18c   : > { %v1472_v38 = vpop.f32.mrb[14].mxu0  ;;  %v2442_v39 = vpop.f32.mrb[15].mxu1 }
 0x18d   : > { %v2651_v40 = vadd.f32 %v1472_v38, %v820_v37  ;;  %v2586_v41 = vpop.f32.mrb[15].mxu0  ;;  %v1700_v38 = vpop.permute.xlu0 %1699 }
 0x191   : > { %v825_v42 = vpop.f32.mrb[16].mxu1 }
 0x192   : > { %v1477_v43 = vpop.f32.mrb[16].mxu0  ;;  %v2445_v44 = vpop.f32.mrb[17].mxu1 }
 0x193   : > { %v2653_v45 = vadd.f32 %v1477_v43, %v825_v42  ;;  %v2589_v46 = vpop.f32.mrb[17].mxu0  ;;  %v828_v47 = vpop.f32.mrb[18].mxu1 }
 0x194   : > { %v1480_v48 = vpop.f32.mrb[18].mxu0  ;;  %v2446_v49 = vpop.f32.mrb[19].mxu1 }
 0x195   : > { %v2655_v50 = vadd.f32 %v1480_v48, %v828_v47  ;;  %v2590_v51 = vpop.f32.mrb[19].mxu0  ;;  %v1705_v42 = vpop.permute.xlu1 %1704 }
 0x199   : > { %v1632_v54 = vpop.f32.mrb[20].mxu1  ;;  %v1715_v47 = vpop.permute.xlu1 %1714 }
 0x19a   : > { %v1608_v55 = vpop.f32.mrb[0].mxu0  ;;  %v3439_v56 = vadd.f32 %v2649_v35, %v1632_v54  ;;  %v2621_v57 = vpop.f32.mrb[21].mxu1 }
 0x19b   : > { %v3441_v58 = vadd.f32 %v1608_v55, %v793_v21  ;;  %v2609_v59 = vpop.f32.mrb[1].mxu0  ;;  %v1635_v60 = vpop.f32.mrb[22].mxu1 }
 0x19c   : > { %v1611_v61 = vpop.f32.mrb[2].mxu0  ;;  %v3443_v62 = vadd.f32 %v2651_v40, %v1635_v60  ;;  %v2622_v63 = vpop.f32.mrb[23].mxu1  ;;  %v1723_v43 = vmul.f32 %v3439_v56, %v1700_v38 }
 0x19d   : > { %v3450_v0 = vadd.f32 %v1611_v61, %v796_v23  ;;  %v2610_v2 = vpop.f32.mrb[3].mxu0  ;;  %v1717_v5 = vmul.f32 %v3441_v58, %v3435_v52 }
 0x19e   : > { %v2175_v4 = vpack.c.bf16 %v3443_v62, %v3439_v56 }
 0x19f   : > { %v1718_v6 = vmul.f32 %v3450_v0, %v3452_v3  ;;  %v2160_v7 = vpack.c.bf16 %v3450_v0, %v3441_v58 }
 0x1a0   : > { %2184 = vst [vmem:[%s3448_s6 + $0x18] sm:$0xff] %v2175_v4  }
 0x1a1   : > { %v1727_v9 = vadd.f32 %v1718_v6, %v1717_v5  ;;  %2161 = vst [vmem:[%s3448_s6] sm:$0xff] %v2160_v7   ;;  %v1640_v10 = vpop.f32.mrb[24].mxu1 }
 0x1a2   : > { %v1616_v11 = vpop.f32.mrb[4].mxu0  ;;  %v3466_v12 = vadd.f32 %v2653_v45, %v1640_v10  ;;  %v2625_v13 = vpop.f32.mrb[25].mxu1  ;;  %v1724_v45 = vmul.f32 %v3443_v62, %v1705_v42 }
 0x1a3   : > { %v3468_v14 = vadd.f32 %v1616_v11, %v801_v25  ;;  %v2613_v15 = vpop.f32.mrb[5].mxu0  ;;  %v1643_v16 = vpop.f32.mrb[26].mxu1 }
 0x1a4   : > { %v1619_v17 = vpop.f32.mrb[6].mxu0  ;;  %v3470_v18 = vadd.f32 %v2655_v50, %v1643_v16  ;;  %v2626_v19 = vpop.f32.mrb[27].mxu1 }
 0x1a5   : > { %v1719_v20 = vmul.f32 %v3468_v14, %v3437_v53  ;;  %v2646_v21 = vadd.f32 %v1619_v17, %v3428_v27  ;;  %v2614_v22 = vpop.f32.mrb[7].mxu0 }
 0x1a6   : > { %v2180_v23 = vpack.c.bf16 %v3470_v18, %v3466_v12 }
 0x1a7   : > { %v1728_v24 = vadd.f32 %v1727_v9, %v1719_v20  ;;  %v1720_v25 = vmul.f32 %v2646_v21, %v3463_v8  ;;  %v2165_v26 = vpack.c.bf16 %v2646_v21, %v3468_v14 }
 0x1a8   : > { %2185 = vst [vmem:[%s3448_s6 + $0x20] sm:$0xff] %v2180_v23  }
 0x1a9   : > { %v1729_v30 = vadd.f32 %v1728_v24, %v1720_v25  ;;  %2182 = vst [vmem:[%s3448_s6 + $0x8] sm:$0xff] %v2165_v26  }
 0x1aa   : > { %v1624_v32 = vpop.f32.mrb[8].mxu0 }
 0x1ab   : > { %v2647_v33 = vadd.f32 %v1624_v32, %v3430_v29  ;;  %v2617_v34 = vpop.f32.mrb[9].mxu0  ;;  %v1710_v29 = vpop.permute.xlu0 %1709 }
 0x1ac   : > { %v1627_v27 = vpop.f32.mrb[10].mxu0  ;;  %v1725_v48 = vmul.f32 %v3466_v12, %v1710_v29 }
 0x1ad   : > { %v1721_v35 = vmul.f32 %v2647_v33, %v1690_v28  ;;  %v2648_v36 = vadd.f32 %v1627_v27, %v3432_v31  ;;  %v2618_v37 = vpop.f32.mrb[11].mxu0  ;;  %v1726_v31 = vmul.f32 %v3470_v18, %v1715_v47 }
 0x1af   : > { %v1730_v39 = vadd.f32 %v1729_v30, %v1721_v35  ;;  %v1722_v40 = vmul.f32 %v2648_v36, %v1695_v1  ;;  %v2170_v41 = vpack.c.bf16 %v2648_v36, %v2647_v33 }
 0x1b1   : > { %v1731_v44 = vadd.f32 %v1730_v39, %v1722_v40  ;;  %2183 = vst [vmem:[%s3448_s6 + $0x10] sm:$0xff] %v2170_v41  }
 0x1b3   : > { %v1732_v46 = vadd.f32 %v1731_v44, %v1723_v43 }
 0x1b5   : > { %v1733_v49 = vadd.f32 %v1732_v46, %v1724_v45 }
 0x1b7   : > { %v1734_v50 = vadd.f32 %v1733_v49, %v1725_v48 }
 0x1b9   : > { %v1735_v51 = vadd.f32 %v1734_v50, %v1726_v31 }
 0x1bb   : > { %v1736_v54 = vrot.slane %v1735_v51, 4 }
 0x1bd   : > { %v1737_v55 = vadd.f32 %v1736_v54, %v1735_v51 }
 0x1bf   : > { %v1738_v57 = vrot.slane %v1737_v55, 2 }
 0x1c1   : > { %v1739_v59 = vadd.f32 %v1738_v57, %v1737_v55 }
 0x1c3   : > { %v1740_v60 = vrot.slane %v1739_v59, 1 }
 0x1c5   : > { %v1741_v61 = vadd.f32 %v1740_v60, %v1739_v59 }
 0x1c7   : > { %v1742_v63 = vmul.f32 0.015625, %v1741_v61  ;;  %1763 = vst [vmem:[%s3492_s11] sm:$0x1] %v1741_v61 }
 0x1c9   : > { %v1743_v2 = vsub.f32 %v3441_v58, %v1742_v63  ;;  %v1744_v4 = vsub.f32 %v3450_v0, %v1742_v63  ;;  %v1745_v5 = vsub.f32 %v3468_v14, %v1742_v63  ;;  %v1746_v6 = vsub.f32 %v2646_v21, %v1742_v63 }
 0x1ca   : > { %v1747_v7 = vsub.f32 %v2647_v33, %v1742_v63  ;;  %v1748_v9 = vsub.f32 %v2648_v36, %v1742_v63  ;;  %v1749_v10 = vsub.f32 %v3439_v56, %v1742_v63  ;;  %v1750_v11 = vsub.f32 %v3443_v62, %v1742_v63 }
 0x1cb   : > { %v1751_v13 = vsub.f32 %v3466_v12, %v1742_v63  ;;  %v1752_v15 = vsub.f32 %v3470_v18, %v1742_v63  ;;  %v1753_v16 = vmul.f32 %v1743_v2, %v3435_v52  ;;  %v1754_v17 = vmul.f32 %v1744_v4, %v3452_v3 }
 0x1cc   : > { %v1755_v58 = vmul.f32 %v1745_v5, %v3437_v53  ;;  %v1756_v0 = vmul.f32 %v1746_v6, %v3463_v8  ;;  %v1757_v20 = vmul.f32 %v1747_v7, %v1690_v28  ;;  %v1758_v56 = vmul.f32 %v1748_v9, %v1695_v1 }
 0x1cd   : > { %v1764_v14 = vmul.f32 %v1753_v16, %v1753_v16  ;;  %v1765_v19 = vmul.f32 %v1754_v17, %v1754_v17  ;;  %v1759_v24 = vmul.f32 %v1749_v10, %v1700_v38  ;;  %v1760_v18 = vmul.f32 %v1750_v11, %v1705_v42 }
 0x1ce   : > { %v1766_v21 = vmul.f32 %v1755_v58, %v1755_v58  ;;  %v1767_v23 = vmul.f32 %v1756_v0, %v1756_v0  ;;  %v1768_v12 = vmul.f32 %v1757_v20, %v1757_v20  ;;  %v1769_v26 = vmul.f32 %v1758_v56, %v1758_v56 }
 0x1cf   : > { %v1774_v22 = vadd.f32 %v1765_v19, %v1764_v14  ;;  %v1761_v30 = vmul.f32 %v1751_v13, %v1710_v29  ;;  %v1770_v3 = vmul.f32 %v1759_v24, %v1759_v24  ;;  %v1762_v32 = vmul.f32 %v1752_v15, %v1715_v47 }
 0x1d0   : > { %v1771_v8 = vmul.f32 %v1760_v18, %v1760_v18 }
 0x1d1   : > { %v1775_v62 = vadd.f32 %v1774_v22, %v1766_v21  ;;  %v1772_v34 = vmul.f32 %v1761_v30, %v1761_v30  ;;  %v1773_v27 = vmul.f32 %v1762_v32, %v1762_v32 }
 0x1d3   : > { %v1776_v25 = vadd.f32 %v1775_v62, %v1767_v23 }
 0x1d5   : > { %v1777_v52 = vadd.f32 %v1776_v25, %v1768_v12 }
 0x1d7   : > { %v1778_v53 = vadd.f32 %v1777_v52, %v1769_v26 }
 0x1d9   : > { %v1779_v33 = vadd.f32 %v1778_v53, %v1770_v3 }
 0x1db   : > { %v1780_v28 = vadd.f32 %v1779_v33, %v1771_v8 }
 0x1dd   : > { %v1781_v35 = vadd.f32 %v1780_v28, %v1772_v34 }
 0x1df   : > { %v1782_v1 = vadd.f32 %v1781_v35, %v1773_v27 }
 0x1e1   : > { %v1783_v36 = vrot.slane %v1782_v1, 4 }
 0x1e3   : > { %v1784_v37 = vadd.f32 %v1783_v36, %v1782_v1 }
 0x1e5   : > { %v1785_v38 = vrot.slane %v1784_v37, 2 }
 0x1e7   : > { %v1786_v39 = vadd.f32 %v1785_v38, %v1784_v37 }
 0x1e9   : > { %v1787_v40 = vrot.slane %v1786_v39, 1 }
 0x1eb   : > { %v1788_v41 = vadd.f32 %v1787_v40, %v1786_v39 }
 0x1ed   : > { %1789 = vst [vmem:[%s3492_s11 + $0x1] sm:$0x1] %v1788_v41 }
 0x1ee PF: > { %s15_s15 = sadd.s32 1, %s2881_s15  }
 0x1ef   : > { %p12_p5 = scmp.ge.s32.totalorder %s15_s15, 4  }
 0x1f1   :  { %14 = sbr.rel (!%p12_p5) target bundleno = 1 (0x1), region = 82 }

</bundles_post_ra>
